<compile_context>
chip_gen: v7x
topology: tpu7x:2x2x1
jax: 0.10.0
libtpu: 0.0.40
codegen_flags: <defaults>
</compile_context>

<pallas_src>
import math

import jax
import jax.numpy as jnp
from jax.experimental import pallas as pl
from jax.experimental.pallas import tpu as pltpu

BN_EPS = 1e-5
LANE = 128
SUBLANE = 8

_VMEM = pl.BlockSpec(memory_space=pltpu.MemorySpace.VMEM)
_SMEM = pl.BlockSpec(memory_space=pltpu.MemorySpace.SMEM)


def _round_up(v, m):
    return ((v + m - 1) // m) * m


def _pad2(a, rows, cols):
    return jnp.pad(a, ((0, rows - a.shape[0]), (0, cols - a.shape[1])))


# ----------------------------- Pallas kernel ------------------------------

def make_encoder_kernel(num_layers, hidden_pad, n_real, n_pad):
    """Fully fused encoder: all GIN layers + BN/ReLU + pooling, one program."""

    def kernel(eps_ref, x_ref, adj_ref, pool_ref, wf_ref, ws_ref, vec_ref,
               node_out, graph_out):
        adj = adj_ref[...]            # bf16 (n_pad, n_pad)
        pool = pool_ref[...]          # bf16 (g_pad, n_pad)
        vecs = vec_ref[...]           # f32  (6*L, hidden_pad) b1,g1,be1,b2,g2,be2
        h = x_ref[...]                # f32  (n_pad, feat_pad)

        inv_n = jnp.float32(1.0 / n_real)
        if n_pad > n_real:            # static branch; unused at test shapes
            rid = jax.lax.broadcasted_iota(jnp.int32, (n_pad, 1), 0)
            rmask = (rid < n_real).astype(jnp.float32)
        else:
            rmask = None

        def bn_relu(z, gamma, beta):
            # Training-mode BatchNorm1d (biased var) + ReLU. Two-pass stats to
            # avoid E[x^2] - mu^2 cancellation.
            if rmask is not None:
                z = z * rmask
            mu = jnp.sum(z, axis=0, keepdims=True) * inv_n
            d = z - mu
            dm = d if rmask is None else d * rmask
            var = jnp.sum(d * dm, axis=0, keepdims=True) * inv_n
            y = jnp.maximum(d * jax.lax.rsqrt(var + BN_EPS) * gamma + beta, 0.0)
            if rmask is not None:
                y = y * rmask
            return y
            # TODO(synk): at large N fold these axis-0 sums into a ones-row MXU
            #             matmul instead of cross-sublane XLU reductions.

        ws_idx = 0
        for l in range(num_layers):                       # statically unrolled
            eps = eps_ref[l]                              # SMEM scalar read
            b1 = vecs[6 * l + 0:6 * l + 1, :]
            g1 = vecs[6 * l + 1:6 * l + 2, :]
            be1 = vecs[6 * l + 2:6 * l + 3, :]
            b2 = vecs[6 * l + 3:6 * l + 4, :]
            g2 = vecs[6 * l + 4:6 * l + 5, :]
            be2 = vecs[6 * l + 5:6 * l + 6, :]
            if l == 0:
                w1 = wf_ref[...]                          # (feat_pad, hidden_pad)
            else:
                w1 = ws_ref[ws_idx]                       # (hidden_pad, hidden_pad)
                ws_idx += 1
            w2 = ws_ref[ws_idx]
            ws_idx += 1

            # GIN sum aggregation: (1 + eps) * h + A @ h   (bf16 MXU, f32 acc)
            agg = (1.0 + eps) * h + jnp.dot(
                adj, h.astype(jnp.bfloat16), preferred_element_type=jnp.float32)

            # GINMLP layer 1: Linear -> BN -> ReLU
            h1 = jnp.dot(agg.astype(jnp.bfloat16), w1,
                         preferred_element_type=jnp.float32) + b1
            h1 = bn_relu(h1, g1, be1)

            # GINMLP layer 2: Linear, then Encoder's per-layer BN + ReLU
            h2 = jnp.dot(h1.astype(jnp.bfloat16), w2,
                         preferred_element_type=jnp.float32) + b2
            h = bn_relu(h2, g2, be2)

            # lane-dense 128-wide slab stores at static aligned offsets:
            # no in-kernel concat, earlier layer activations are not kept live
            lo = l * hidden_pad
            node_out[:, lo:lo + hidden_pad] = h
            graph_out[:, lo:lo + hidden_pad] = jnp.dot(
                pool, h.astype(jnp.bfloat16), preferred_element_type=jnp.float32)

    return kernel


# ------------------------------ Encoder glue ------------------------------

def init_encoder_params(key, in_feats, hidden_dim, num_layers=3):
    params = []
    for i in range(num_layers):
        fin = in_feats if i == 0 else hidden_dim
        key, k1, k2, k3, k4 = jax.random.split(key, 5)
        s1 = 1.0 / jnp.sqrt(fin)
        s2 = 1.0 / jnp.sqrt(hidden_dim)
        params.append(dict(
            eps=jnp.zeros((1, 1), jnp.float32),                  # train_eps init 0
            w1=jax.random.uniform(k1, (fin, hidden_dim), jnp.float32, -s1, s1),
            b1=jax.random.uniform(k2, (1, hidden_dim), jnp.float32, -s1, s1),
            g1=jnp.ones((1, hidden_dim), jnp.float32),           # MLP-internal BN
            be1=jnp.zeros((1, hidden_dim), jnp.float32),
            w2=jax.random.uniform(k3, (hidden_dim, hidden_dim), jnp.float32, -s2, s2),
            b2=jax.random.uniform(k4, (1, hidden_dim), jnp.float32, -s2, s2),
            g2=jnp.ones((1, hidden_dim), jnp.float32),           # Encoder BN
            be2=jnp.zeros((1, hidden_dim), jnp.float32),
        ))
    return params


def encoder_forward(x, edge_index, batch, params, num_graphs):
    n, in_feats = x.shape
    num_layers = len(params)
    hidden = params[0]["w2"].shape[1]

    h_pad = _round_up(hidden, LANE)
    f_pad = _round_up(in_feats, LANE)
    n_pad = _round_up(n, SUBLANE)
    g_pad = _round_up(num_graphs, SUBLANE)

    # glue: dense adjacency (spmm source) + one-hot pooling matrix, bf16 exact
    # for 0/1 entries.
    # TODO(synk): replace with a scalar-prefetched sparse gather / tiled
    #             contraction for non-toy N (dense N^2 won't fit v7x VMEM).
    adj = jnp.zeros((n_pad, n_pad), jnp.float32)
    adj = adj.at[edge_index[0], edge_index[1]].add(1.0).astype(jnp.bfloat16)
    pool = (jnp.arange(g_pad, dtype=batch.dtype)[:, None] == batch[None, :])
    pool = jnp.pad(pool.astype(jnp.float32), ((0, 0), (0, n_pad - n)))
    pool = pool.astype(jnp.bfloat16)

    xp = _pad2(x.astype(jnp.float32), n_pad, f_pad)

    # packed parameters: 1 SMEM eps vector + 3 VMEM refs instead of ~26 tiny refs
    eps_vec = jnp.concatenate(
        [p["eps"].reshape(1) for p in params]).astype(jnp.float32)
    wf = _pad2(params[0]["w1"], f_pad, h_pad).astype(jnp.bfloat16)
    ws_list = []
    for l, p in enumerate(params):
        if l > 0:
            ws_list.append(_pad2(p["w1"], h_pad, h_pad))
        ws_list.append(_pad2(p["w2"], h_pad, h_pad))
    ws = jnp.stack(ws_list).astype(jnp.bfloat16)          # (2L-1, h_pad, h_pad)
    vec_rows = []
    for p in params:
        for name in ("b1", "g1", "be1", "b2", "g2", "be2"):
            vec_rows.append(_pad2(p[name], 1, h_pad))
    vec = jnp.concatenate(vec_rows, axis=0).astype(jnp.float32)   # (6L, h_pad)

    out_shapes = (
        jax.ShapeDtypeStruct((n_pad, num_layers * h_pad), jnp.float32),
        jax.ShapeDtypeStruct((g_pad, num_layers * h_pad), jnp.float32),
    )

    operands = (eps_vec, xp, adj, pool, wf, ws, vec)
    total_bytes = sum(a.size * a.dtype.itemsize for a in operands)
    total_bytes += sum(math.prod(s.shape) * jnp.dtype(s.dtype).itemsize
                       for s in out_shapes)
    # size-derived limit with headroom; never ask for all of v7x's 64 MiB VMEM
    vmem_limit = int(min(48 * 2**20, max(16 * 2**20, 4 * total_bytes)))

    kernel = make_encoder_kernel(num_layers, h_pad, n, n_pad)
    node_slab, graph_slab = pl.pallas_call(
        kernel,
        out_shape=out_shapes,
        in_specs=[_SMEM] + [_VMEM] * 6,
        out_specs=(_VMEM, _VMEM),
        compiler_params=pltpu.CompilerParams(vmem_limit_bytes=vmem_limit),
    )(*operands)
    # TODO(synk): add a node-row grid axis marked "parallel" (two-phase BN
    #             reduction) to use both v7x TensorCores at realistic N.

    node_rep = jnp.concatenate(
        [node_slab[:n, l * h_pad:l * h_pad + hidden] for l in range(num_layers)],
        axis=1)
    graph_rep = jnp.concatenate(
        [graph_slab[:num_graphs, l * h_pad:l * h_pad + hidden]
         for l in range(num_layers)], axis=1)
    return graph_rep, node_rep


def encoder_reference(x, edge_index, batch, params, num_graphs):
    """Pure-JAX f32 reference (PyTorch semantics) for a correctness check."""
    def bn(h, gamma, beta):
        mu = jnp.mean(h, axis=0, keepdims=True)
        var = jnp.mean((h - mu) ** 2, axis=0, keepdims=True)
        return (h - mu) * jax.lax.rsqrt(var + BN_EPS) * gamma + beta

    n = x.shape[0]
    adj = jnp.zeros((n, n), jnp.float32).at[edge_index[0], edge_index[1]].add(1.0)
    pool_mat = (batch[None, :] == jnp.arange(num_graphs)[:, None]).astype(jnp.float32)
    layer_rep = []
    h = x
    for lp in params:
        hh = (1.0 + lp["eps"][0, 0]) * h + adj @ h
        h1 = jnp.maximum(bn(hh @ lp["w1"] + lp["b1"], lp["g1"], lp["be1"]), 0.0)
        h = jnp.maximum(bn(h1 @ lp["w2"] + lp["b2"], lp["g2"], lp["be2"]), 0.0)
        layer_rep.append(h)
    pooled = [pool_mat @ h for h in layer_rep]
    return jnp.concatenate(pooled, axis=1), jnp.concatenate(layer_rep, axis=1)


if __name__ == "__main__":
    key = jax.random.PRNGKey(0)

    N_NODES, IN_FEATS, HIDDEN, NUM_LAYERS = 24, 16, 32, 3
    NUM_GRAPHS, N_EDGES = 3, 64

    key, kx, ke = jax.random.split(key, 3)
    x = jax.random.normal(kx, (N_NODES, IN_FEATS), jnp.float32)
    edge_index = jax.random.randint(ke, (2, N_EDGES), 0, N_NODES, jnp.int32)
    batch = jnp.repeat(jnp.arange(NUM_GRAPHS, dtype=jnp.int32),
                       N_NODES // NUM_GRAPHS)

    params = init_encoder_params(key, IN_FEATS, HIDDEN, NUM_LAYERS)

    graph_rep, node_rep = encoder_forward(x, edge_index, batch, params, NUM_GRAPHS)
    graph_rep = jax.block_until_ready(graph_rep)
    node_rep = jax.block_until_ready(node_rep)

    assert graph_rep.shape == (NUM_GRAPHS, NUM_LAYERS * HIDDEN)
    assert node_rep.shape == (N_NODES, NUM_LAYERS * HIDDEN)

    # sanity check against pure-JAX f32 reference (kernel uses bf16 MXU
    # operands with f32 accumulation, hence the 5e-2 tolerance)
    g_ref, n_ref = encoder_reference(x, edge_index, batch, params, NUM_GRAPHS)
    assert jnp.allclose(graph_rep, g_ref, rtol=5e-2, atol=5e-2), "graph_rep mismatch"
    assert jnp.allclose(node_rep, n_ref, rtol=5e-2, atol=5e-2), "node_rep mismatch"

    print("KERNEL_OK")
</pallas_src>

<mosaic_0001>
module attributes {stable_mosaic.version = 11 : i64} {
  func.func @kernel(%arg0: memref<3xf32, #tpu.memory_space<smem>>, %arg1: memref<24x128xf32, #tpu.memory_space<vmem>>, %arg2: memref<24x24xbf16, #tpu.memory_space<vmem>>, %arg3: memref<8x24xbf16, #tpu.memory_space<vmem>>, %arg4: memref<128x128xbf16, #tpu.memory_space<vmem>>, %arg5: memref<5x128x128xbf16, #tpu.memory_space<vmem>>, %arg6: memref<18x128xf32, #tpu.memory_space<vmem>>, %arg7: memref<24x384xf32, #tpu.memory_space<vmem>>, %arg8: memref<8x384xf32, #tpu.memory_space<vmem>>) attributes {dimension_semantics = [], scalar_prefetch = 0 : i64, scratch_operands = 0 : i64, tpu.core_type = #tpu.core_type<tc>} {
    %c0 = arith.constant 0 : index
    %c0_0 = arith.constant 0 : index
    %0 = vector.load %arg2[%c0, %c0_0] : memref<24x24xbf16, #tpu.memory_space<vmem>>, vector<24x24xbf16>
    %c0_1 = arith.constant 0 : index
    %c0_2 = arith.constant 0 : index
    %1 = vector.load %arg3[%c0_1, %c0_2] : memref<8x24xbf16, #tpu.memory_space<vmem>>, vector<8x24xbf16>
    %c0_3 = arith.constant 0 : index
    %c0_4 = arith.constant 0 : index
    %2 = vector.load %arg6[%c0_3, %c0_4] : memref<18x128xf32, #tpu.memory_space<vmem>>, vector<18x128xf32>
    %c0_5 = arith.constant 0 : index
    %c0_6 = arith.constant 0 : index
    %3 = vector.load %arg1[%c0_5, %c0_6] : memref<24x128xf32, #tpu.memory_space<vmem>>, vector<24x128xf32>
    %c0_7 = arith.constant 0 : index
    %4 = memref.load %arg0[%c0_7] : memref<3xf32, #tpu.memory_space<smem>>
    %5 = vector.extract_strided_slice %2 {offsets = [0, 0], sizes = [1, 128], strides = [1, 1]} : vector<18x128xf32> to vector<1x128xf32>
    %6 = vector.extract_strided_slice %2 {offsets = [1, 0], sizes = [1, 128], strides = [1, 1]} : vector<18x128xf32> to vector<1x128xf32>
    %7 = vector.extract_strided_slice %2 {offsets = [2, 0], sizes = [1, 128], strides = [1, 1]} : vector<18x128xf32> to vector<1x128xf32>
    %8 = vector.extract_strided_slice %2 {offsets = [3, 0], sizes = [1, 128], strides = [1, 1]} : vector<18x128xf32> to vector<1x128xf32>
    %9 = vector.extract_strided_slice %2 {offsets = [4, 0], sizes = [1, 128], strides = [1, 1]} : vector<18x128xf32> to vector<1x128xf32>
    %10 = vector.extract_strided_slice %2 {offsets = [5, 0], sizes = [1, 128], strides = [1, 1]} : vector<18x128xf32> to vector<1x128xf32>
    %c0_8 = arith.constant 0 : index
    %c0_9 = arith.constant 0 : index
    %11 = vector.load %arg4[%c0_8, %c0_9] : memref<128x128xbf16, #tpu.memory_space<vmem>>, vector<128x128xbf16>
    %c0_10 = arith.constant 0 : index
    %c0_11 = arith.constant 0 : index
    %c0_12 = arith.constant 0 : index
    %12 = vector.load %arg5[%c0_10, %c0_11, %c0_12] : memref<5x128x128xbf16, #tpu.memory_space<vmem>>, vector<1x128x128xbf16>
    %13 = vector.shape_cast %12 : vector<1x128x128xbf16> to vector<128x128xbf16>
    %cst = arith.constant 1.000000e+00 : f32
    %14 = arith.addf %cst, %4 : f32
    %15 = vector.broadcast %14 : f32 to vector<24x128xf32>
    %16 = arith.mulf %15, %3 : vector<24x128xf32>
    %17 = arith.truncf %3 : vector<24x128xf32> to vector<24x128xbf16>
    %cst_13 = arith.constant dense<0.000000e+00> : vector<24x128xf32>
    %18 = tpu.matmul %0, %17, %cst_13 {dimension_numbers = #tpu.dot_dimension_numbers<[1], [0], [0], [1], [0, 0, 1, 1], [], []>} : vector<24x24xbf16>, vector<24x128xbf16>, vector<24x128xf32> -> vector<24x128xf32>
    %19 = arith.addf %16, %18 : vector<24x128xf32>
    %20 = arith.truncf %19 : vector<24x128xf32> to vector<24x128xbf16>
    %cst_14 = arith.constant dense<0.000000e+00> : vector<24x128xf32>
    %21 = tpu.matmul %20, %11, %cst_14 {dimension_numbers = #tpu.dot_dimension_numbers<[1], [0], [0], [1], [0, 0, 1, 1], [], []>} : vector<24x128xbf16>, vector<128x128xbf16>, vector<24x128xf32> -> vector<24x128xf32>
    %22 = vector.broadcast %5 : vector<1x128xf32> to vector<24x128xf32>
    %23 = arith.addf %21, %22 : vector<24x128xf32>
    %cst_15 = arith.constant dense<0.000000e+00> : vector<128xf32>
    %24 = vector.multi_reduction <add>, %23, %cst_15 [0] : vector<24x128xf32> to vector<128xf32>
    %25 = vector.shape_cast %24 : vector<128xf32> to vector<1x128xf32>
    %cst_16 = arith.constant 0.0416666679 : f32
    %26 = vector.broadcast %cst_16 : f32 to vector<1x128xf32>
    %27 = arith.mulf %25, %26 : vector<1x128xf32>
    %28 = vector.broadcast %27 : vector<1x128xf32> to vector<24x128xf32>
    %29 = arith.subf %23, %28 : vector<24x128xf32>
    %30 = arith.mulf %29, %29 : vector<24x128xf32>
    %cst_17 = arith.constant dense<0.000000e+00> : vector<128xf32>
    %31 = vector.multi_reduction <add>, %30, %cst_17 [0] : vector<24x128xf32> to vector<128xf32>
    %32 = vector.shape_cast %31 : vector<128xf32> to vector<1x128xf32>
    %cst_18 = arith.constant 0.0416666679 : f32
    %33 = vector.broadcast %cst_18 : f32 to vector<1x128xf32>
    %34 = arith.mulf %32, %33 : vector<1x128xf32>
    %cst_19 = arith.constant 9.99999974E-6 : f32
    %35 = vector.broadcast %cst_19 : f32 to vector<1x128xf32>
    %36 = arith.addf %34, %35 : vector<1x128xf32>
    %37 = math.rsqrt %36 : vector<1x128xf32>
    %38 = vector.broadcast %37 : vector<1x128xf32> to vector<24x128xf32>
    %39 = arith.mulf %29, %38 : vector<24x128xf32>
    %40 = vector.broadcast %6 : vector<1x128xf32> to vector<24x128xf32>
    %41 = arith.mulf %39, %40 : vector<24x128xf32>
    %42 = vector.broadcast %7 : vector<1x128xf32> to vector<24x128xf32>
    %43 = arith.addf %41, %42 : vector<24x128xf32>
    %cst_20 = arith.constant 0.000000e+00 : f32
    %44 = vector.broadcast %cst_20 : f32 to vector<24x128xf32>
    %45 = arith.maximumf %43, %44 : vector<24x128xf32>
    %46 = arith.truncf %45 : vector<24x128xf32> to vector<24x128xbf16>
    %cst_21 = arith.constant dense<0.000000e+00> : vector<24x128xf32>
    %47 = tpu.matmul %46, %13, %cst_21 {dimension_numbers = #tpu.dot_dimension_numbers<[1], [0], [0], [1], [0, 0, 1, 1], [], []>} : vector<24x128xbf16>, vector<128x128xbf16>, vector<24x128xf32> -> vector<24x128xf32>
    %48 = vector.broadcast %8 : vector<1x128xf32> to vector<24x128xf32>
    %49 = arith.addf %47, %48 : vector<24x128xf32>
    %cst_22 = arith.constant dense<0.000000e+00> : vector<128xf32>
    %50 = vector.multi_reduction <add>, %49, %cst_22 [0] : vector<24x128xf32> to vector<128xf32>
    %51 = vector.shape_cast %50 : vector<128xf32> to vector<1x128xf32>
    %cst_23 = arith.constant 0.0416666679 : f32
    %52 = vector.broadcast %cst_23 : f32 to vector<1x128xf32>
    %53 = arith.mulf %51, %52 : vector<1x128xf32>
    %54 = vector.broadcast %53 : vector<1x128xf32> to vector<24x128xf32>
    %55 = arith.subf %49, %54 : vector<24x128xf32>
    %56 = arith.mulf %55, %55 : vector<24x128xf32>
    %cst_24 = arith.constant dense<0.000000e+00> : vector<128xf32>
    %57 = vector.multi_reduction <add>, %56, %cst_24 [0] : vector<24x128xf32> to vector<128xf32>
    %58 = vector.shape_cast %57 : vector<128xf32> to vector<1x128xf32>
    %cst_25 = arith.constant 0.0416666679 : f32
    %59 = vector.broadcast %cst_25 : f32 to vector<1x128xf32>
    %60 = arith.mulf %58, %59 : vector<1x128xf32>
    %cst_26 = arith.constant 9.99999974E-6 : f32
    %61 = vector.broadcast %cst_26 : f32 to vector<1x128xf32>
    %62 = arith.addf %60, %61 : vector<1x128xf32>
    %63 = math.rsqrt %62 : vector<1x128xf32>
    %64 = vector.broadcast %63 : vector<1x128xf32> to vector<24x128xf32>
    %65 = arith.mulf %55, %64 : vector<24x128xf32>
    %66 = vector.broadcast %9 : vector<1x128xf32> to vector<24x128xf32>
    %67 = arith.mulf %65, %66 : vector<24x128xf32>
    %68 = vector.broadcast %10 : vector<1x128xf32> to vector<24x128xf32>
    %69 = arith.addf %67, %68 : vector<24x128xf32>
    %cst_27 = arith.constant 0.000000e+00 : f32
    %70 = vector.broadcast %cst_27 : f32 to vector<24x128xf32>
    %71 = arith.maximumf %69, %70 : vector<24x128xf32>
    %c0_28 = arith.constant 0 : index
    %c0_29 = arith.constant 0 : index
    %72 = vector.load %arg7[%c0_28, %c0_29] : memref<24x384xf32, #tpu.memory_space<vmem>>, vector<24x128xf32>
    tpu.vector_store %arg7[%c0_28, %c0_29], %71 {strides = array<i32>} : memref<24x384xf32, #tpu.memory_space<vmem>>, vector<24x128xf32>,
    %73 = arith.truncf %71 : vector<24x128xf32> to vector<24x128xbf16>
    %cst_30 = arith.constant dense<0.000000e+00> : vector<8x128xf32>
    %74 = tpu.matmul %1, %73, %cst_30 {dimension_numbers = #tpu.dot_dimension_numbers<[1], [0], [0], [1], [0, 0, 1, 1], [], []>} : vector<8x24xbf16>, vector<24x128xbf16>, vector<8x128xf32> -> vector<8x128xf32>
    %c0_31 = arith.constant 0 : index
    %c0_32 = arith.constant 0 : index
    %75 = vector.load %arg8[%c0_31, %c0_32] : memref<8x384xf32, #tpu.memory_space<vmem>>, vector<8x128xf32>
    tpu.vector_store %arg8[%c0_31, %c0_32], %74 {strides = array<i32>} : memref<8x384xf32, #tpu.memory_space<vmem>>, vector<8x128xf32>,
    %c1 = arith.constant 1 : index
    %76 = memref.load %arg0[%c1] : memref<3xf32, #tpu.memory_space<smem>>
    %77 = vector.extract_strided_slice %2 {offsets = [6, 0], sizes = [1, 128], strides = [1, 1]} : vector<18x128xf32> to vector<1x128xf32>
    %78 = vector.extract_strided_slice %2 {offsets = [7, 0], sizes = [1, 128], strides = [1, 1]} : vector<18x128xf32> to vector<1x128xf32>
    %79 = vector.extract_strided_slice %2 {offsets = [8, 0], sizes = [1, 128], strides = [1, 1]} : vector<18x128xf32> to vector<1x128xf32>
    %80 = vector.extract_strided_slice %2 {offsets = [9, 0], sizes = [1, 128], strides = [1, 1]} : vector<18x128xf32> to vector<1x128xf32>
    %81 = vector.extract_strided_slice %2 {offsets = [10, 0], sizes = [1, 128], strides = [1, 1]} : vector<18x128xf32> to vector<1x128xf32>
    %82 = vector.extract_strided_slice %2 {offsets = [11, 0], sizes = [1, 128], strides = [1, 1]} : vector<18x128xf32> to vector<1x128xf32>
    %c1_33 = arith.constant 1 : index
    %c0_34 = arith.constant 0 : index
    %c0_35 = arith.constant 0 : index
    %83 = vector.load %arg5[%c1_33, %c0_34, %c0_35] : memref<5x128x128xbf16, #tpu.memory_space<vmem>>, vector<1x128x128xbf16>
    %84 = vector.shape_cast %83 : vector<1x128x128xbf16> to vector<128x128xbf16>
    %c2 = arith.constant 2 : index
    %c0_36 = arith.constant 0 : index
    %c0_37 = arith.constant 0 : index
    %85 = vector.load %arg5[%c2, %c0_36, %c0_37] : memref<5x128x128xbf16, #tpu.memory_space<vmem>>, vector<1x128x128xbf16>
    %86 = vector.shape_cast %85 : vector<1x128x128xbf16> to vector<128x128xbf16>
    %cst_38 = arith.constant 1.000000e+00 : f32
    %87 = arith.addf %cst_38, %76 : f32
    %88 = vector.broadcast %87 : f32 to vector<24x128xf32>
    %89 = arith.mulf %88, %71 : vector<24x128xf32>
    %90 = arith.truncf %71 : vector<24x128xf32> to vector<24x128xbf16>
    %cst_39 = arith.constant dense<0.000000e+00> : vector<24x128xf32>
    %91 = tpu.matmul %0, %90, %cst_39 {dimension_numbers = #tpu.dot_dimension_numbers<[1], [0], [0], [1], [0, 0, 1, 1], [], []>} : vector<24x24xbf16>, vector<24x128xbf16>, vector<24x128xf32> -> vector<24x128xf32>
    %92 = arith.addf %89, %91 : vector<24x128xf32>
    %93 = arith.truncf %92 : vector<24x128xf32> to vector<24x128xbf16>
    %cst_40 = arith.constant dense<0.000000e+00> : vector<24x128xf32>
    %94 = tpu.matmul %93, %84, %cst_40 {dimension_numbers = #tpu.dot_dimension_numbers<[1], [0], [0], [1], [0, 0, 1, 1], [], []>} : vector<24x128xbf16>, vector<128x128xbf16>, vector<24x128xf32> -> vector<24x128xf32>
    %95 = vector.broadcast %77 : vector<1x128xf32> to vector<24x128xf32>
    %96 = arith.addf %94, %95 : vector<24x128xf32>
    %cst_41 = arith.constant dense<0.000000e+00> : vector<128xf32>
    %97 = vector.multi_reduction <add>, %96, %cst_41 [0] : vector<24x128xf32> to vector<128xf32>
    %98 = vector.shape_cast %97 : vector<128xf32> to vector<1x128xf32>
    %cst_42 = arith.constant 0.0416666679 : f32
    %99 = vector.broadcast %cst_42 : f32 to vector<1x128xf32>
    %100 = arith.mulf %98, %99 : vector<1x128xf32>
    %101 = vector.broadcast %100 : vector<1x128xf32> to vector<24x128xf32>
    %102 = arith.subf %96, %101 : vector<24x128xf32>
    %103 = arith.mulf %102, %102 : vector<24x128xf32>
    %cst_43 = arith.constant dense<0.000000e+00> : vector<128xf32>
    %104 = vector.multi_reduction <add>, %103, %cst_43 [0] : vector<24x128xf32> to vector<128xf32>
    %105 = vector.shape_cast %104 : vector<128xf32> to vector<1x128xf32>
    %cst_44 = arith.constant 0.0416666679 : f32
    %106 = vector.broadcast %cst_44 : f32 to vector<1x128xf32>
    %107 = arith.mulf %105, %106 : vector<1x128xf32>
    %cst_45 = arith.constant 9.99999974E-6 : f32
    %108 = vector.broadcast %cst_45 : f32 to vector<1x128xf32>
    %109 = arith.addf %107, %108 : vector<1x128xf32>
    %110 = math.rsqrt %109 : vector<1x128xf32>
    %111 = vector.broadcast %110 : vector<1x128xf32> to vector<24x128xf32>
    %112 = arith.mulf %102, %111 : vector<24x128xf32>
    %113 = vector.broadcast %78 : vector<1x128xf32> to vector<24x128xf32>
    %114 = arith.mulf %112, %113 : vector<24x128xf32>
    %115 = vector.broadcast %79 : vector<1x128xf32> to vector<24x128xf32>
    %116 = arith.addf %114, %115 : vector<24x128xf32>
    %cst_46 = arith.constant 0.000000e+00 : f32
    %117 = vector.broadcast %cst_46 : f32 to vector<24x128xf32>
    %118 = arith.maximumf %116, %117 : vector<24x128xf32>
    %119 = arith.truncf %118 : vector<24x128xf32> to vector<24x128xbf16>
    %cst_47 = arith.constant dense<0.000000e+00> : vector<24x128xf32>
    %120 = tpu.matmul %119, %86, %cst_47 {dimension_numbers = #tpu.dot_dimension_numbers<[1], [0], [0], [1], [0, 0, 1, 1], [], []>} : vector<24x128xbf16>, vector<128x128xbf16>, vector<24x128xf32> -> vector<24x128xf32>
    %121 = vector.broadcast %80 : vector<1x128xf32> to vector<24x128xf32>
    %122 = arith.addf %120, %121 : vector<24x128xf32>
    %cst_48 = arith.constant dense<0.000000e+00> : vector<128xf32>
    %123 = vector.multi_reduction <add>, %122, %cst_48 [0] : vector<24x128xf32> to vector<128xf32>
    %124 = vector.shape_cast %123 : vector<128xf32> to vector<1x128xf32>
    %cst_49 = arith.constant 0.0416666679 : f32
    %125 = vector.broadcast %cst_49 : f32 to vector<1x128xf32>
    %126 = arith.mulf %124, %125 : vector<1x128xf32>
    %127 = vector.broadcast %126 : vector<1x128xf32> to vector<24x128xf32>
    %128 = arith.subf %122, %127 : vector<24x128xf32>
    %129 = arith.mulf %128, %128 : vector<24x128xf32>
    %cst_50 = arith.constant dense<0.000000e+00> : vector<128xf32>
    %130 = vector.multi_reduction <add>, %129, %cst_50 [0] : vector<24x128xf32> to vector<128xf32>
    %131 = vector.shape_cast %130 : vector<128xf32> to vector<1x128xf32>
    %cst_51 = arith.constant 0.0416666679 : f32
    %132 = vector.broadcast %cst_51 : f32 to vector<1x128xf32>
    %133 = arith.mulf %131, %132 : vector<1x128xf32>
    %cst_52 = arith.constant 9.99999974E-6 : f32
    %134 = vector.broadcast %cst_52 : f32 to vector<1x128xf32>
    %135 = arith.addf %133, %134 : vector<1x128xf32>
    %136 = math.rsqrt %135 : vector<1x128xf32>
    %137 = vector.broadcast %136 : vector<1x128xf32> to vector<24x128xf32>
    %138 = arith.mulf %128, %137 : vector<24x128xf32>
    %139 = vector.broadcast %81 : vector<1x128xf32> to vector<24x128xf32>
    %140 = arith.mulf %138, %139 : vector<24x128xf32>
    %141 = vector.broadcast %82 : vector<1x128xf32> to vector<24x128xf32>
    %142 = arith.addf %140, %141 : vector<24x128xf32>
    %cst_53 = arith.constant 0.000000e+00 : f32
    %143 = vector.broadcast %cst_53 : f32 to vector<24x128xf32>
    %144 = arith.maximumf %142, %143 : vector<24x128xf32>
    %c0_54 = arith.constant 0 : index
    %c128 = arith.constant 128 : index
    %145 = vector.load %arg7[%c0_54, %c128] : memref<24x384xf32, #tpu.memory_space<vmem>>, vector<24x128xf32>
    tpu.vector_store %arg7[%c0_54, %c128], %144 {strides = array<i32>} : memref<24x384xf32, #tpu.memory_space<vmem>>, vector<24x128xf32>,
    %146 = arith.truncf %144 : vector<24x128xf32> to vector<24x128xbf16>
    %cst_55 = arith.constant dense<0.000000e+00> : vector<8x128xf32>
    %147 = tpu.matmul %1, %146, %cst_55 {dimension_numbers = #tpu.dot_dimension_numbers<[1], [0], [0], [1], [0, 0, 1, 1], [], []>} : vector<8x24xbf16>, vector<24x128xbf16>, vector<8x128xf32> -> vector<8x128xf32>
    %c0_56 = arith.constant 0 : index
    %c128_57 = arith.constant 128 : index
    %148 = vector.load %arg8[%c0_56, %c128_57] : memref<8x384xf32, #tpu.memory_space<vmem>>, vector<8x128xf32>
    tpu.vector_store %arg8[%c0_56, %c128_57], %147 {strides = array<i32>} : memref<8x384xf32, #tpu.memory_space<vmem>>, vector<8x128xf32>,
    %c2_58 = arith.constant 2 : index
    %149 = memref.load %arg0[%c2_58] : memref<3xf32, #tpu.memory_space<smem>>
    %150 = vector.extract_strided_slice %2 {offsets = [12, 0], sizes = [1, 128], strides = [1, 1]} : vector<18x128xf32> to vector<1x128xf32>
    %151 = vector.extract_strided_slice %2 {offsets = [13, 0], sizes = [1, 128], strides = [1, 1]} : vector<18x128xf32> to vector<1x128xf32>
    %152 = vector.extract_strided_slice %2 {offsets = [14, 0], sizes = [1, 128], strides = [1, 1]} : vector<18x128xf32> to vector<1x128xf32>
    %153 = vector.extract_strided_slice %2 {offsets = [15, 0], sizes = [1, 128], strides = [1, 1]} : vector<18x128xf32> to vector<1x128xf32>
    %154 = vector.extract_strided_slice %2 {offsets = [16, 0], sizes = [1, 128], strides = [1, 1]} : vector<18x128xf32> to vector<1x128xf32>
    %155 = vector.extract_strided_slice %2 {offsets = [17, 0], sizes = [1, 128], strides = [1, 1]} : vector<18x128xf32> to vector<1x128xf32>
    %c3 = arith.constant 3 : index
    %c0_59 = arith.constant 0 : index
    %c0_60 = arith.constant 0 : index
    %156 = vector.load %arg5[%c3, %c0_59, %c0_60] : memref<5x128x128xbf16, #tpu.memory_space<vmem>>, vector<1x128x128xbf16>
    %157 = vector.shape_cast %156 : vector<1x128x128xbf16> to vector<128x128xbf16>
    %c4 = arith.constant 4 : index
    %c0_61 = arith.constant 0 : index
    %c0_62 = arith.constant 0 : index
    %158 = vector.load %arg5[%c4, %c0_61, %c0_62] : memref<5x128x128xbf16, #tpu.memory_space<vmem>>, vector<1x128x128xbf16>
    %159 = vector.shape_cast %158 : vector<1x128x128xbf16> to vector<128x128xbf16>
    %cst_63 = arith.constant 1.000000e+00 : f32
    %160 = arith.addf %cst_63, %149 : f32
    %161 = vector.broadcast %160 : f32 to vector<24x128xf32>
    %162 = arith.mulf %161, %144 : vector<24x128xf32>
    %163 = arith.truncf %144 : vector<24x128xf32> to vector<24x128xbf16>
    %cst_64 = arith.constant dense<0.000000e+00> : vector<24x128xf32>
    %164 = tpu.matmul %0, %163, %cst_64 {dimension_numbers = #tpu.dot_dimension_numbers<[1], [0], [0], [1], [0, 0, 1, 1], [], []>} : vector<24x24xbf16>, vector<24x128xbf16>, vector<24x128xf32> -> vector<24x128xf32>
    %165 = arith.addf %162, %164 : vector<24x128xf32>
    %166 = arith.truncf %165 : vector<24x128xf32> to vector<24x128xbf16>
    %cst_65 = arith.constant dense<0.000000e+00> : vector<24x128xf32>
    %167 = tpu.matmul %166, %157, %cst_65 {dimension_numbers = #tpu.dot_dimension_numbers<[1], [0], [0], [1], [0, 0, 1, 1], [], []>} : vector<24x128xbf16>, vector<128x128xbf16>, vector<24x128xf32> -> vector<24x128xf32>
    %168 = vector.broadcast %150 : vector<1x128xf32> to vector<24x128xf32>
    %169 = arith.addf %167, %168 : vector<24x128xf32>
    %cst_66 = arith.constant dense<0.000000e+00> : vector<128xf32>
    %170 = vector.multi_reduction <add>, %169, %cst_66 [0] : vector<24x128xf32> to vector<128xf32>
    %171 = vector.shape_cast %170 : vector<128xf32> to vector<1x128xf32>
    %cst_67 = arith.constant 0.0416666679 : f32
    %172 = vector.broadcast %cst_67 : f32 to vector<1x128xf32>
    %173 = arith.mulf %171, %172 : vector<1x128xf32>
    %174 = vector.broadcast %173 : vector<1x128xf32> to vector<24x128xf32>
    %175 = arith.subf %169, %174 : vector<24x128xf32>
    %176 = arith.mulf %175, %175 : vector<24x128xf32>
    %cst_68 = arith.constant dense<0.000000e+00> : vector<128xf32>
    %177 = vector.multi_reduction <add>, %176, %cst_68 [0] : vector<24x128xf32> to vector<128xf32>
    %178 = vector.shape_cast %177 : vector<128xf32> to vector<1x128xf32>
    %cst_69 = arith.constant 0.0416666679 : f32
    %179 = vector.broadcast %cst_69 : f32 to vector<1x128xf32>
    %180 = arith.mulf %178, %179 : vector<1x128xf32>
    %cst_70 = arith.constant 9.99999974E-6 : f32
    %181 = vector.broadcast %cst_70 : f32 to vector<1x128xf32>
    %182 = arith.addf %180, %181 : vector<1x128xf32>
    %183 = math.rsqrt %182 : vector<1x128xf32>
    %184 = vector.broadcast %183 : vector<1x128xf32> to vector<24x128xf32>
    %185 = arith.mulf %175, %184 : vector<24x128xf32>
    %186 = vector.broadcast %151 : vector<1x128xf32> to vector<24x128xf32>
    %187 = arith.mulf %185, %186 : vector<24x128xf32>
    %188 = vector.broadcast %152 : vector<1x128xf32> to vector<24x128xf32>
    %189 = arith.addf %187, %188 : vector<24x128xf32>
    %cst_71 = arith.constant 0.000000e+00 : f32
    %190 = vector.broadcast %cst_71 : f32 to vector<24x128xf32>
    %191 = arith.maximumf %189, %190 : vector<24x128xf32>
    %192 = arith.truncf %191 : vector<24x128xf32> to vector<24x128xbf16>
    %cst_72 = arith.constant dense<0.000000e+00> : vector<24x128xf32>
    %193 = tpu.matmul %192, %159, %cst_72 {dimension_numbers = #tpu.dot_dimension_numbers<[1], [0], [0], [1], [0, 0, 1, 1], [], []>} : vector<24x128xbf16>, vector<128x128xbf16>, vector<24x128xf32> -> vector<24x128xf32>
    %194 = vector.broadcast %153 : vector<1x128xf32> to vector<24x128xf32>
    %195 = arith.addf %193, %194 : vector<24x128xf32>
    %cst_73 = arith.constant dense<0.000000e+00> : vector<128xf32>
    %196 = vector.multi_reduction <add>, %195, %cst_73 [0] : vector<24x128xf32> to vector<128xf32>
    %197 = vector.shape_cast %196 : vector<128xf32> to vector<1x128xf32>
    %cst_74 = arith.constant 0.0416666679 : f32
    %198 = vector.broadcast %cst_74 : f32 to vector<1x128xf32>
    %199 = arith.mulf %197, %198 : vector<1x128xf32>
    %200 = vector.broadcast %199 : vector<1x128xf32> to vector<24x128xf32>
    %201 = arith.subf %195, %200 : vector<24x128xf32>
    %202 = arith.mulf %201, %201 : vector<24x128xf32>
    %cst_75 = arith.constant dense<0.000000e+00> : vector<128xf32>
    %203 = vector.multi_reduction <add>, %202, %cst_75 [0] : vector<24x128xf32> to vector<128xf32>
    %204 = vector.shape_cast %203 : vector<128xf32> to vector<1x128xf32>
    %cst_76 = arith.constant 0.0416666679 : f32
    %205 = vector.broadcast %cst_76 : f32 to vector<1x128xf32>
    %206 = arith.mulf %204, %205 : vector<1x128xf32>
    %cst_77 = arith.constant 9.99999974E-6 : f32
    %207 = vector.broadcast %cst_77 : f32 to vector<1x128xf32>
    %208 = arith.addf %206, %207 : vector<1x128xf32>
    %209 = math.rsqrt %208 : vector<1x128xf32>
    %210 = vector.broadcast %209 : vector<1x128xf32> to vector<24x128xf32>
    %211 = arith.mulf %201, %210 : vector<24x128xf32>
    %212 = vector.broadcast %154 : vector<1x128xf32> to vector<24x128xf32>
    %213 = arith.mulf %211, %212 : vector<24x128xf32>
    %214 = vector.broadcast %155 : vector<1x128xf32> to vector<24x128xf32>
    %215 = arith.addf %213, %214 : vector<24x128xf32>
    %cst_78 = arith.constant 0.000000e+00 : f32
    %216 = vector.broadcast %cst_78 : f32 to vector<24x128xf32>
    %217 = arith.maximumf %215, %216 : vector<24x128xf32>
    %c0_79 = arith.constant 0 : index
    %c256 = arith.constant 256 : index
    %218 = vector.load %arg7[%c0_79, %c256] : memref<24x384xf32, #tpu.memory_space<vmem>>, vector<24x128xf32>
    tpu.vector_store %arg7[%c0_79, %c256], %217 {strides = array<i32>} : memref<24x384xf32, #tpu.memory_space<vmem>>, vector<24x128xf32>,
    %219 = arith.truncf %217 : vector<24x128xf32> to vector<24x128xbf16>
    %cst_80 = arith.constant dense<0.000000e+00> : vector<8x128xf32>
    %220 = tpu.matmul %1, %219, %cst_80 {dimension_numbers = #tpu.dot_dimension_numbers<[1], [0], [0], [1], [0, 0, 1, 1], [], []>} : vector<8x24xbf16>, vector<24x128xbf16>, vector<8x128xf32> -> vector<8x128xf32>
    %c0_81 = arith.constant 0 : index
    %c256_82 = arith.constant 256 : index
    %221 = vector.load %arg8[%c0_81, %c256_82] : memref<8x384xf32, #tpu.memory_space<vmem>>, vector<8x128xf32>
    tpu.vector_store %arg8[%c0_81, %c256_82], %220 {strides = array<i32>} : memref<8x384xf32, #tpu.memory_space<vmem>>, vector<8x128xf32>,
    return
  }
}

</mosaic_0001>

<bundles_post_ra>
// kernel: tpu_custom_call.1
= control target key start
LH: loop header
LB: loop body
LE: loop exit
PB: predicated region body
PF: predicated region fallthrough
CT: control target
= control target key end

     0   :  { %14 = vsyncpa [#allocation5], 0  ;;  %s2340_s0 = inlined_call_operand.hbm [shape: f32[3], index: 0, kind: input, shape index: {}]   ;;  %s2341_s1 = inlined_call_operand.hbm [shape: f32[24,128], index: 1, kind: input, shape index: {}]   ;;  %s2342_s2 = inlined_call_operand.hbm [shape: bf16[24,24], index: 2, kind: input, shape index: {}]   ;;  %s2343_s3 = inlined_call_operand.vmem [shape: bf16[8,24], index: 3, kind: input, shape index: {}]   ;;  %s2344_s4 = inlined_call_operand.hbm [shape: bf16[128,128], index: 4, kind: input, shape index: {}]   ;;  %s2345_s5 = inlined_call_operand.hbm [shape: bf16[5,128,128], index: 5, kind: input, shape index: {}]   ;;  %s2346_s6 = inlined_call_operand.hbm [shape: f32[18,128], index: 6, kind: input, shape index: {}]   ;;  %s2347_s7 = inlined_call_operand.hbm [shape: f32[24,384], index: 7, kind: output, shape index: {0}]   ;;  %s2348_s8 = inlined_call_operand.hbm [shape: f32[8,384], index: 8, kind: output, shape index: {1}]  }
   0x1   :  { %15 = vsyncpa [#allocation3], 0 }
   0x2   :  { %16 = vsyncpa [#allocation8], 0 }
   0x3   :  { %17 = vsyncpa [#allocation11], 0 }
   0x4   :  { %18 = vsyncpa [#allocation4], 0 }
   0x5   :  { %19 = vsyncpa [#allocation15], 0  ;;  %s2051_s27 = smov [#allocation7]   ;;  %s1875_s9 = scalar_lea.hbm %s2342_s2, 192 }
   0x6   :  { %s45_s28 = sshll.u32 %s2051_s27, 4  ;;  %p1876_p0 = scmp.ne.s32.totalorder %s2342_s2, %s1875_s9  ;;  %s46_s28 = int_to_ptr.vmem [resolvable:$true] %s45_s28 }
   0x7   :  { %p1879_p1 = scmp.lt.u32.totalorder %s1875_s9, %s2342_s2 }
   0x9   :  { %p1881_p2 = pnand %p1879_p1, %p1876_p0 }
   0xb   :  { %1884 = shalt.err (!%p1881_p2)
}
   0xc   :  { %s1885_s14 = scalar_lea.vmem %s46_s28, 192  ;;  %p1890_p4 = scmp.lt.s32.totalorder %s46_s28, %s46_s28 }
   0xd   :  { %p1886_p3 = scmp.ne.s32.totalorder %s46_s28, %s1885_s14  ;;  %p1891_p5 = scmp.lt.s32.totalorder %s1885_s14, %s1885_s14 }
   0xf   :  { %p1892_p6 = por %p1891_p5, %p1890_p4 }
  0x11   :  { %p1893_p7 = pnand %p1892_p6, %p1886_p3 }
  0x13   :  { %1896 = shalt.err (!%p1893_p7)
}
  0x14   :  { %s2052_s15 = smov 64   ;;  %s2053_s16 = smov 4  }
  0x15   :  { %51 = dma.hbm_to_vmem [thread:$0]  %s2342_s2, 192, %s46_s28, [#allocation8], %s2052_s15, %s2052_s15, %s2053_s16  }
  0x16   :  { %s2054_s19 = smov [#allocation10]   ;;  %s1897_s23 = scalar_lea.hbm %s2345_s5, 5120 }
  0x17   :  { %s71_s20 = sshll.u32 %s2054_s19, 4  ;;  %p1898_p8 = scmp.ne.s32.totalorder %s2345_s5, %s1897_s23  ;;  %s72_s20 = int_to_ptr.vmem [resolvable:$true] %s71_s20 }
  0x18   :  { %p1901_p9 = scmp.lt.u32.totalorder %s1897_s23, %s2345_s5 }
  0x1a   :  { %p1903_p10 = pnand %p1901_p9, %p1898_p8 }
  0x1c   :  { %1906 = shalt.err (!%p1903_p10)
}
  0x1d   :  { %s1907_s29 = scalar_lea.vmem %s72_s20, 5120  ;;  %p1912_p12 = scmp.lt.s32.totalorder %s72_s20, %s72_s20 }
  0x1e   :  { %p1908_p11 = scmp.ne.s32.totalorder %s72_s20, %s1907_s29  ;;  %p1913_p13 = scmp.lt.s32.totalorder %s1907_s29, %s1907_s29 }
  0x20   :  { %p1914_p0 = por %p1913_p13, %p1912_p12 }
  0x22   :  { %p1915_p1 = pnand %p1914_p0, %p1908_p11 }
  0x24   :  { %1918 = shalt.err (!%p1915_p1)
}
  0x25   :  { %77 = dma.hbm_to_vmem [thread:$0]  %s2345_s5, 5120, %s72_s20, [#allocation11], %s2052_s15, %s2052_s15, %s2053_s16  }
  0x26   :  { %s1919_s10 = scalar_lea.hbm %s2340_s0, 16 }
  0x27   :  { %p1920_p2 = scmp.ne.s32.totalorder %s2340_s0, %s1919_s10  ;;  %p1923_p3 = scmp.lt.u32.totalorder %s1919_s10, %s2340_s0 }
  0x29   :  { %p1925_p4 = pnand %p1923_p3, %p1920_p2 }
  0x2b   :  { %1928 = shalt.err (!%p1925_p4)
}
  0x2c   :  { %s2055_s17 = smov [#allocation2]   ;;  %s2056_s5 = smov [#allocation6]  }
  0x2d   :  { %27 = dma.hbm_to_smem %s2340_s0, 16, %s2055_s17, [#allocation5]  }
  0x2e   :  { %s33_s20 = sshll.u32 %s2056_s5, 4  ;;  %s1929_s23 = scalar_lea.hbm %s2341_s1, 384  ;;  %s34_s20 = int_to_ptr.vmem [resolvable:$true] %s33_s20 }
  0x2f   :  { %p1930_p5 = scmp.ne.s32.totalorder %s2341_s1, %s1929_s23  ;;  %p1933_p6 = scmp.lt.u32.totalorder %s1929_s23, %s2341_s1 }
  0x31   :  { %p1935_p7 = pnand %p1933_p6, %p1930_p5 }
  0x33   :  { %1938 = shalt.err (!%p1935_p7)
}
  0x34   :  { %s1939_s29 = scalar_lea.vmem %s34_s20, 384  ;;  %p1944_p9 = scmp.lt.s32.totalorder %s34_s20, %s34_s20 }
  0x35   :  { %p1940_p8 = scmp.ne.s32.totalorder %s34_s20, %s1939_s29  ;;  %p1945_p10 = scmp.lt.s32.totalorder %s1939_s29, %s1939_s29 }
  0x37   :  { %p1946_p11 = por %p1945_p10, %p1944_p9 }
  0x39   :  { %p1947_p12 = pnand %p1946_p11, %p1940_p8 }
  0x3b   :  { %1950 = shalt.err (!%p1947_p12)
}
  0x3c   :  { %s2057_s0 = smov 128   ;;  %s2058_s2 = smov 8  }
  0x3d   :  { %39 = dma.hbm_to_vmem [thread:$0]  %s2341_s1, 384, %s34_s20, [#allocation3], %s2057_s0, %s2057_s0, %s2058_s2  }
  0x3e   :  { %s2059_s9 = smov [#allocation9]   ;;  %s2060_s11 = smov [#allocation12]  }
  0x3f   :  { %s59_s10 = sshll.u32 %s2059_s9, 4  ;;  %s83_s12 = sshll.u32 %s2060_s11, 4  ;;  %s60_s10 = int_to_ptr.vmem [resolvable:$true] %s59_s10  ;;  %s2169_s12 = int_to_ptr.vmem [resolvable:$true] %s83_s12 }
  0x40   :  { %s1951_s17 = scalar_lea.hbm %s2344_s4, 1024 }
  0x41   :  { %p1952_p13 = scmp.ne.s32.totalorder %s2344_s4, %s1951_s17  ;;  %p1955_p0 = scmp.lt.u32.totalorder %s1951_s17, %s2344_s4 }
  0x43   :  { %p1957_p1 = pnand %p1955_p0, %p1952_p13 }
  0x45   :  { %1960 = shalt.err (!%p1957_p1)
}
  0x46   :  { %s1961_s1 = scalar_lea.vmem %s60_s10, 1024  ;;  %p1966_p3 = scmp.lt.s32.totalorder %s60_s10, %s60_s10 }
  0x47   :  { %p1962_p2 = scmp.ne.s32.totalorder %s60_s10, %s1961_s1  ;;  %p1967_p4 = scmp.lt.s32.totalorder %s1961_s1, %s1961_s1 }
  0x49   :  { %p1968_p5 = por %p1967_p4, %p1966_p3 }
  0x4b   :  { %p1969_p6 = pnand %p1968_p5, %p1962_p2 }
  0x4d   :  { %1972 = shalt.err (!%p1969_p6)
}
  0x4e   :  { %65 = dma.hbm_to_vmem [thread:$0]  %s2344_s4, 1024, %s60_s10, [#allocation8], %s2052_s15, %s2052_s15, %s2053_s16  }
  0x4f   :  { %s1973_s25 = scalar_lea.hbm %s2346_s6, 384 }
  0x50   :  { %p1974_p7 = scmp.ne.s32.totalorder %s2346_s6, %s1973_s25  ;;  %p1977_p8 = scmp.lt.u32.totalorder %s1973_s25, %s2346_s6 }
  0x52   :  { %p1979_p9 = pnand %p1977_p8, %p1974_p7 }
  0x54   :  { %1982 = shalt.err (!%p1979_p9)
}
  0x55   :  { %s1983_s30 = scalar_lea.vmem %s2169_s12, 384  ;;  %p1988_p11 = scmp.lt.s32.totalorder %s2169_s12, %s2169_s12 }
  0x56   :  { %p1984_p10 = scmp.ne.s32.totalorder %s2169_s12, %s1983_s30  ;;  %p1989_p12 = scmp.lt.s32.totalorder %s1983_s30, %s1983_s30 }
  0x58   :  { %p1990_p13 = por %p1989_p12, %p1988_p11 }
  0x5a   :  { %p1991_p0 = pnand %p1990_p13, %p1984_p10 }
  0x5c   :  { %1994 = shalt.err (!%p1991_p0)
}
  0x5d   :  { %89 = dma.hbm_to_vmem [thread:$0]  %s2346_s6, 384, %s2169_s12, [#allocation11], %s2057_s0, %s2057_s0, %s2058_s2  }
  0x5e   :  { %2039 = dma.done.wait [#allocation5], 16  }
  0x5f   :  { %2040 = vsyncadd [#allocation5], 4294967280 }
  0x60   :  { %2041 = dma.done.wait [#allocation3], 384  }
  0x61   :  { %2042 = vsyncadd [#allocation3], 4294966912 }
  0x62   :  { %2043 = dma.done.wait [#allocation8], 1216  }
  0x63   :  { %2044 = vsyncadd [#allocation8], 4294966080 }
  0x64   :  { %2045 = dma.done.wait [#allocation11], 5504  }
  0x65   :  { %2046 = vsyncadd [#allocation11], 4294961792 }
  0x66   :  { %108 = sfence }
  0x67   :  { %v117_v0 = vld [vmem:[#allocation6] sm:$0xff]  ;;  %v118_v1 = vld [vmem:[#allocation6 + $0x8] sm:$0xff]  ;;  %v119_v2 = vld [vmem:[#allocation6 + $0x10] sm:$0xff]  ;;  %vm168_vm0 = vcmask 195584   ;;  %vm175_vm1 = vcmask 1043456   ;;  %s120_s6 = sld [smem:[#allocation2]]  ;;  %v232_v37 = vlaneseq }
  0x68   :  { %v158_v3 = vpack.c.bf16 %v118_v1, %v117_v0  ;;  %v159_v4 = vpack.c.bf16 %v119_v2, %v119_v2  ;;  %v2206_v5 = vld [vmem:[#allocation7] sm:$0xff]   ;;  %v1815_v6 = vld [vmem:[#allocation9] sm:$0xff]   ;;  %v1816_v7 = vld [vmem:[#allocation9 + $0x8] sm:$0xff]   ;;  %vm2062_vm2 = vmmov 0   ;;  %s1525_s10 = sld [smem:[#allocation2 + $0x2]]  ;;  %s2063_s12 = smov [#allocation13]  }
  0x69   :  { %1630 = vmatprep.mubr.msk.bf16.mxu0 %vm168_vm0, %v2206_v5  ;;  %1634 = vmatprep.subr.bf16.mxu1 %v1815_v6  ;;  %v2212_v9 = vld [vmem:[#allocation7 + $0x8] ss:$0 sps:$4 sm:$0xff]   ;;  %v1817_v10 = vld [vmem:[#allocation9 + $0x10] sm:$0xff]   ;;  %v1819_v12 = vld [vmem:[#allocation9 + $0x20] sm:$0xff]   ;;  %v2216_v38 = vshrl.u32 %v232_v37, 7  ;;  %s1455_s13 = sshll.u32 %s2063_s12, 4  ;;  %s1456_s13 = int_to_ptr.vmem [resolvable:$true] %s1455_s13 }
  0x6a   :  { %1626 = vmatprep.subr.bf16.mxu0 %v158_v3  ;;  %v177_v8 = vsel %vm175_vm1, %v159_v4, 0  ;;  %1635 = vmatpush3.bf16.msra.mxu1 %v1815_v6  ;;  %v1818_v11 = vld [vmem:[#allocation9 + $0x18] sm:$0xff]   ;;  %v1820_v13 = vld [vmem:[#allocation9 + $0x28] sm:$0xff]   ;;  %v1821_v14 = vld [vmem:[#allocation9 + $0x30] sm:$0xff]   ;;  %s1995_s14 = scalar_lea.vmem %s1456_s13, 1152  ;;  %p2000_p2 = scmp.lt.s32.totalorder %s1456_s13, %s1456_s13 }
  0x6b   :  { %1627 = vmatpush3.bf16.msra.mxu0 %v158_v3  ;;  %1636 = vmatprep.subr.bf16.mxu1 %v1816_v7  ;;  %v1822_v15 = vld [vmem:[#allocation9 + $0x38] sm:$0xff]   ;;  %v1823_v29 = vld [vmem:[#allocation10] sm:$0xff]   ;;  %v1824_v30 = vld [vmem:[#allocation10 + $0x8] sm:$0xff]   ;;  %v2219_v39 = vsub.s32 0, %v2216_v38  ;;  %p1996_p1 = scmp.ne.s32.totalorder %s1456_s13, %s1995_s14  ;;  %p2001_p3 = scmp.lt.s32.totalorder %s1995_s14, %s1995_s14 }
  0x6c   :  { %1794 = vmatprep.subr.msk.bf16.mxu0 %vm175_vm1, %v159_v4  ;;  %v1825_v31 = vld [vmem:[#allocation10 + $0x10] sm:$0xff]   ;;  %v1826_v32 = vld [vmem:[#allocation10 + $0x18] sm:$0xff]   ;;  %v1827_v33 = vld [vmem:[#allocation10 + $0x20] sm:$0xff]  }
  0x6d   :  { %s153_s16 = sadd.f32 1.0, %s120_s6  ;;  %v1828_v34 = vld [vmem:[#allocation10 + $0x28] sm:$0xff]   ;;  %v1829_v35 = vld [vmem:[#allocation10 + $0x30] sm:$0xff]   ;;  %v1830_v36 = vld [vmem:[#allocation10 + $0x38] sm:$0xff]   ;;  %p2002_p4 = por %p2001_p3, %p2000_p2 }
  0x6e   :  { %1637 = vmatpush3.bf16.msra.mxu1 %v1816_v7  ;;  %v2221_v40 = vld [vmem:[#allocation12] sm:$0xff]  ;;  %s1049_s11 = sadd.f32 1.0, %s1525_s10 }
  0x6f   :  { %1629 = vmatpush3.bf16.msra.mxu0 %v177_v8  ;;  %1638 = vmatprep.subr.bf16.mxu1 %v1817_v10  ;;  %v154_v16 = vstv %s153_s16  ;;  %v235_v41 = vrot.slane %v2221_v40, %v2219_v39  ;;  %p2003_p5 = pnand %p2002_p4, %p1996_p1 }
  0x70   :  { %v157_v17 = vmul.f32 %v154_v16, %v119_v2  ;;  %v155_v19 = vmul.f32 %v154_v16, %v117_v0  ;;  %v156_v20 = vmul.f32 %v154_v16, %v118_v1  ;;  %1654 = vmatprep.subr.bf16.mxu0 %v1823_v29 }
  0x72   :  { %1631 = vmatmul.mubr.msk.bf16.vlgmr.msra.gmra.mrb[0].mxu0 %vm168_vm0, %v2212_v9  ;;  %1639 = vmatpush3.bf16.msra.mxu1 %v1817_v10 }
  0x73   :  { %1640 = vmatprep.subr.bf16.mxu1 %v1818_v11  ;;  %1655 = vmatpush3.bf16.msra.mxu0 %v1823_v29 }
  0x74   :  { %1656 = vmatprep.subr.bf16.mxu0 %v1824_v30 }
  0x76   :  { %1641 = vmatpush3.bf16.msra.mxu1 %v1818_v11 }
  0x77   :  { %1642 = vmatprep.subr.bf16.mxu1 %v1819_v12  ;;  %1657 = vmatpush3.bf16.msra.mxu0 %v1824_v30 }
  0x78   :  { %1658 = vmatprep.subr.bf16.mxu0 %v1825_v31 }
  0x7a   :  { %1643 = vmatpush3.bf16.msra.mxu1 %v1819_v12  ;;  %v2226_v12 = vsub.s32 1, %v2216_v38 }
  0x7b   :  { %1644 = vmatprep.subr.bf16.mxu1 %v1820_v13  ;;  %1659 = vmatpush3.bf16.msra.mxu0 %v1825_v31  ;;  %v2061_v31 = vmov 0.0  }
  0x7c   :  { %1660 = vmatprep.subr.bf16.mxu0 %v1826_v32 }
  0x7e   :  { %1645 = vmatpush3.bf16.msra.mxu1 %v1820_v13  ;;  %v370_v13 = vsub.s32 2, %v2216_v38 }
  0x7f   :  { %1646 = vmatprep.subr.bf16.mxu1 %v1821_v14  ;;  %1661 = vmatpush3.bf16.msra.mxu0 %v1826_v32  ;;  %v382_v32 = vsub.s32 3, %v2216_v38 }
  0x80   :  { %1662 = vmatprep.subr.bf16.mxu0 %v1827_v33 }
  0x82   :  { %1647 = vmatpush3.bf16.msra.mxu1 %v1821_v14  ;;  %v364_v14 = vrot.slane %v2221_v40, %v2226_v12 }
  0x83   :  { %1648 = vmatprep.subr.bf16.mxu1 %v1822_v15  ;;  %1663 = vmatpush3.bf16.msra.mxu0 %v1827_v33  ;;  %v383_v33 = vrot.slane %v2221_v40, %v382_v32 }
  0x84   :  { %1664 = vmatprep.subr.bf16.mxu0 %v1828_v34 }
  0x86   :  { %1649 = vmatpush3.bf16.msra.mxu1 %v1822_v15 }
  0x87   :  { %1665 = vmatpush3.bf16.msra.mxu0 %v1828_v34  ;;  %1674 = vmatprep.subr.bf16.mxu1 %v2061_v31 }
  0x88   :  { %1666 = vmatprep.subr.bf16.mxu0 %v1829_v35 }
  0x8b   :  { %1667 = vmatpush3.bf16.msra.mxu0 %v1829_v35 }
  0x8c   :  { %1668 = vmatprep.subr.bf16.mxu0 %v1830_v36 }
  0x8f   :  { %1669 = vmatpush3.bf16.msra.mxu0 %v1830_v36 }
 0x145   :  { %v1632_v18 = vpop.f32.mrb[0].mxu0 }
 0x146   :  { %v229_v21 = vadd.f32 %v1632_v18, %v157_v17  ;;  %v213_v22 = vpop.f32.mrb[1].mxu0  ;;  %v371_v18 = vrot.slane %v2221_v40, %v370_v13 }
 0x147   :  { %v1633_v23 = vpop.f32.mrb[2].mxu0  ;;  %v227_v25 = vadd.f32 %v213_v22, %v155_v19 }
 0x148   :  { %v216_v24 = vpop.f32.mrb[3].mxu0  ;;  %v231_v28 = vpack.c.bf16 %v229_v21, %v229_v21 }
 0x149   :  { %v228_v26 = vadd.f32 %v216_v24, %v156_v20 }
 0x14b   :  { %v230_v27 = vpack.c.bf16 %v228_v26, %v227_v25 }
 0x14d   :  { %1650 = vmatprep.mubr.bf16.mxu1 %v230_v27 }
 0x14e   :  { %1651 = vmatmul.mubr.bf16.vlgmr.msra.gmra.mrb[0].mxu1 %v231_v28 }
 0x14f   :  { %1678 = vmatprep.mubr.msk.bf16.mxu1 %vm2062_vm2, %v2061_v31 }
 0x221   :  { %v1652_v42 = vpop.f32.mrb[0].mxu1 }
 0x222   :  { %v318_v43 = vpop.f32.mrb[1].mxu1  ;;  %v327_v48 = vadd.f32 %v1652_v42, %v235_v41 }
 0x223   :  { %v1653_v44 = vpop.f32.mrb[2].mxu1  ;;  %v319_v46 = vadd.f32 %v318_v43, %v235_v41 }
 0x224   :  { %v321_v45 = vpop.f32.mrb[3].mxu1 }
 0x225   :  { %v322_v47 = vadd.f32 %v321_v45, %v235_v41 }
 0x227   :  { %v332_v49 = vadd.f32 %v322_v47, %v319_v46 }
 0x229   :  { %v333_v50 = vadd.f32 %v332_v49, %v327_v48 }
 0x22b   :  { %v334_v51 = vrot.slane %v333_v50, 4 }
 0x22d   :  { %v335_v52 = vadd.f32 %v334_v51, %v333_v50 }
 0x22f   :  { %v336_v53 = vrot.slane %v335_v52, 2 }
 0x231   :  { %v337_v54 = vadd.f32 %v336_v53, %v335_v52 }
 0x233   :  { %v338_v55 = vrot.slane %v337_v54, 1 }
 0x235   :  { %v339_v56 = vadd.f32 %v338_v55, %v337_v54 }
 0x237   :  { %v340_v57 = vmul.f32 0.041666668, %v339_v56 }
 0x239   :  { %v341_v58 = vsub.f32 %v319_v46, %v340_v57  ;;  %v342_v59 = vsub.f32 %v322_v47, %v340_v57  ;;  %v343_v60 = vsub.f32 %v327_v48, %v340_v57 }
 0x23b   :  { %v344_v61 = vmul.f32 %v341_v58, %v341_v58  ;;  %v345_v62 = vmul.f32 %v342_v59, %v342_v59  ;;  %v346_v63 = vmul.f32 %v343_v60, %v343_v60 }
 0x23d   :  { %v347_v0 = vadd.f32 %v345_v62, %v344_v61 }
 0x23f   :  { %v348_v1 = vadd.f32 %v347_v0, %v346_v63 }
 0x241   :  { %v349_v2 = vrot.slane %v348_v1, 4 }
 0x243   :  { %v350_v3 = vadd.f32 %v349_v2, %v348_v1 }
 0x245   :  { %v351_v4 = vrot.slane %v350_v3, 2 }
 0x247   :  { %v352_v6 = vadd.f32 %v351_v4, %v350_v3 }
 0x249   :  { %v353_v7 = vrot.slane %v352_v6, 1 }
 0x24b   :  { %v354_v8 = vadd.f32 %v353_v7, %v352_v6  ;;  %v511_v6 = vsub.s32 4, %v2216_v38  ;;  %v518_v7 = vsub.s32 5, %v2216_v38 }
 0x24d   :  { %v355_v10 = vmul.f32 0.041666668, %v354_v8  ;;  %v512_v8 = vrot.slane %v2221_v40, %v511_v6 }
 0x24f   :  { %v356_v11 = vadd.f32 1e-05, %v355_v10 }
 0x251   :  { %1863 = vrsqrt.f32 %v356_v11 }
 0x25b   :  { %v1864_v15 = vpop.eup %1863 }
 0x25c   :  { %v359_v16 = vmul.f32 %v1864_v15, %v342_v59  ;;  %v358_v17 = vmul.f32 %v1864_v15, %v341_v58  ;;  %v360_v19 = vmul.f32 %v1864_v15, %v343_v60 }
 0x25e   :  { %v366_v20 = vmul.f32 %v364_v14, %v359_v16  ;;  %v365_v21 = vmul.f32 %v364_v14, %v358_v17  ;;  %v367_v22 = vmul.f32 %v364_v14, %v360_v19  ;;  %v519_v16 = vrot.slane %v2221_v40, %v518_v7 }
 0x260   :  { %v372_v23 = vadd.f32 %v371_v18, %v365_v21  ;;  %v373_v24 = vadd.f32 %v371_v18, %v366_v20  ;;  %v374_v25 = vadd.f32 %v371_v18, %v367_v22 }
 0x262   :  { %v375_v26 = vmax.f32 %v372_v23, 0.0  ;;  %v376_v27 = vmax.f32 %v373_v24, 0.0  ;;  %v377_v28 = vmax.f32 %v374_v25, 0.0 }
 0x264   :  { %v378_v29 = vpack.c.bf16 %v376_v27, %v375_v26  ;;  %v379_v30 = vpack.c.bf16 %v377_v28, %v377_v28  ;;  %v1831_v28 = vld [vmem:[#allocation10 + $0x40] sm:$0xff]  }
 0x266   :  { %1670 = vmatprep.mubr.bf16.mxu0 %v378_v29 }
 0x267   :  { %1671 = vmatmul.mubr.bf16.vlgmr.msra.gmra.mrb[4].mxu0 %v379_v30  ;;  %v2257_v30 = vld [vmem:[%s2343_s3] sm:$0xf]  ;;  %s1505_s3 = sld [smem:[#allocation2 + $0x1]] }
 0x268   :  { %1686 = vmatprep.mubr.msk.bf16.mxu0 %vm168_vm0, %v2206_v5 }
 0x26d   :  { %s613_s9 = sadd.f32 1.0, %s1505_s3 }
 0x33a   :  { %v1672_v34 = vpop.f32.mrb[4].mxu0 }
 0x33b   :  { %v466_v35 = vpop.f32.mrb[5].mxu0  ;;  %v475_v43 = vadd.f32 %v1672_v34, %v383_v33  ;;  %v1833_v34 = vld [vmem:[#allocation10 + $0x50] sm:$0xff]  }
 0x33c   :  { %v1673_v36 = vpop.f32.mrb[6].mxu0  ;;  %v467_v41 = vadd.f32 %v466_v35, %v383_v33  ;;  %v1834_v35 = vld [vmem:[#allocation10 + $0x58] sm:$0xff]  }
 0x33d   :  { %v469_v37 = vpop.f32.mrb[7].mxu0  ;;  %v1835_v36 = vld [vmem:[#allocation10 + $0x60] sm:$0xff]  }
 0x33e   :  { %v470_v42 = vadd.f32 %v469_v37, %v383_v33  ;;  %v1832_v33 = vld [vmem:[#allocation10 + $0x48] sm:$0xff]  }
 0x33f   :  { %v1836_v37 = vld [vmem:[#allocation10 + $0x68] sm:$0xff]  }
 0x340   :  { %v480_v44 = vadd.f32 %v470_v42, %v467_v41 }
 0x342   :  { %v481_v45 = vadd.f32 %v480_v44, %v475_v43 }
 0x344   :  { %v482_v46 = vrot.slane %v481_v45, 4 }
 0x346   :  { %v483_v47 = vadd.f32 %v482_v46, %v481_v45 }
 0x348   :  { %v484_v48 = vrot.slane %v483_v47, 2 }
 0x34a   :  { %v485_v49 = vadd.f32 %v484_v48, %v483_v47 }
 0x34c   :  { %v486_v50 = vrot.slane %v485_v49, 1 }
 0x34e   :  { %v487_v51 = vadd.f32 %v486_v50, %v485_v49 }
 0x350   :  { %v488_v52 = vmul.f32 0.041666668, %v487_v51 }
 0x352   :  { %v489_v53 = vsub.f32 %v467_v41, %v488_v52  ;;  %v490_v54 = vsub.f32 %v470_v42, %v488_v52  ;;  %v491_v55 = vsub.f32 %v475_v43, %v488_v52  ;;  %v1837_v41 = vld [vmem:[#allocation10 + $0x70] sm:$0xff]   ;;  %v1838_v42 = vld [vmem:[#allocation10 + $0x78] sm:$0xff]   ;;  %v614_v43 = vstv %s613_s9 }
 0x354   :  { %v492_v56 = vmul.f32 %v489_v53, %v489_v53  ;;  %v493_v57 = vmul.f32 %v490_v54, %v490_v54  ;;  %v494_v58 = vmul.f32 %v491_v55, %v491_v55 }
 0x356   :  { %v495_v59 = vadd.f32 %v493_v57, %v492_v56 }
 0x358   :  { %v496_v60 = vadd.f32 %v495_v59, %v494_v58 }
 0x35a   :  { %v497_v61 = vrot.slane %v496_v60, 4 }
 0x35c   :  { %v498_v62 = vadd.f32 %v497_v61, %v496_v60  ;;  %v1839_v60 = vld [vmem:[#allocation10 + $0x80] sm:$0xff]   ;;  %v1840_v61 = vld [vmem:[#allocation10 + $0x88] sm:$0xff]  }
 0x35e   :  { %v499_v63 = vrot.slane %v498_v62, 2 }
 0x360   :  { %v500_v0 = vadd.f32 %v499_v63, %v498_v62  ;;  %v1841_v62 = vld [vmem:[#allocation10 + $0x90] sm:$0xff]   ;;  %v1842_v63 = vld [vmem:[#allocation10 + $0x98] sm:$0xff]  }
 0x362   :  { %v501_v1 = vrot.slane %v500_v0, 1 }
 0x364   :  { %v502_v2 = vadd.f32 %v501_v1, %v500_v0  ;;  %v1843_v0 = vld [vmem:[#allocation10 + $0xa0] sm:$0xff]   ;;  %v1844_v1 = vld [vmem:[#allocation10 + $0xa8] sm:$0xff]  }
 0x366   :  { %v503_v3 = vmul.f32 0.041666668, %v502_v2  ;;  %v1845_v2 = vld [vmem:[#allocation10 + $0xb0] sm:$0xff]  }
 0x368   :  { %v504_v4 = vadd.f32 1e-05, %v503_v3  ;;  %v1846_v3 = vld [vmem:[#allocation10 + $0xb8] sm:$0xff]  }
 0x36a   :  { %1865 = vrsqrt.f32 %v504_v4  ;;  %v673_v4 = vsub.s32 6, %v2216_v38 }
 0x374   :  { %v1866_v10 = vpop.eup %1865 }
 0x375   :  { %v506_v11 = vmul.f32 %v1866_v10, %v489_v53  ;;  %v507_v14 = vmul.f32 %v1866_v10, %v490_v54  ;;  %v508_v15 = vmul.f32 %v1866_v10, %v491_v55 }
 0x377   :  { %v514_v17 = vmul.f32 %v512_v8, %v507_v14  ;;  %v513_v18 = vmul.f32 %v512_v8, %v506_v11  ;;  %v515_v19 = vmul.f32 %v512_v8, %v508_v15  ;;  %v674_v8 = vrot.slane %v2221_v40, %v673_v4 }
 0x379   :  { %v521_v20 = vadd.f32 %v519_v16, %v514_v17  ;;  %v520_v21 = vadd.f32 %v519_v16, %v513_v18  ;;  %v522_v22 = vadd.f32 %v519_v16, %v515_v19 }
 0x37b   :  { %v524_v23 = vmax.f32 %v521_v20, 0.0  ;;  %v523_v24 = vmax.f32 %v520_v21, 0.0  ;;  %v525_v25 = vmax.f32 %v522_v22, 0.0 }
 0x37d   :  { %527 = vst [vmem:[#allocation13 + $0x18] sm:$0xff] %v524_v23  ;;  %526 = vst [vmem:[#allocation13] sm:$0xff] %v523_v24  ;;  %v529_v26 = vpack.c.bf16 %v524_v23, %v523_v24  ;;  %v530_v27 = vpack.c.bf16 %v525_v25, %v525_v25  ;;  %v617_v44 = vmul.f32 %v614_v43, %v525_v25 }
 0x37e   :  { %528 = vst [vmem:[#allocation13 + $0x30] sm:$0xff] %v525_v25  ;;  %v615_v47 = vmul.f32 %v614_v43, %v523_v24  ;;  %v616_v54 = vmul.f32 %v614_v43, %v524_v23 }
 0x37f   :  { %1675 = vmatpush3.bf16.msra.mxu1 %v529_v26  ;;  %1682 = vmatprep.subr.bf16.mxu0 %v529_v26  ;;  %v535_v29 = vsel %vm175_vm1, %v530_v27, 0 }
 0x380   :  { %1683 = vmatpush3.bf16.msra.mxu0 %v529_v26  ;;  %1676 = vmatprep.subr.bf16.mxu1 %v2061_v31 }
 0x381   :  { %1795 = vmatprep.subr.msk.bf16.mxu0 %vm175_vm1, %v530_v27 }
 0x383   :  { %1677 = vmatpush3.bf16.msra.mxu1 %v535_v29 }
 0x384   :  { %1685 = vmatpush3.bf16.msra.mxu0 %v535_v29  ;;  %1690 = vmatprep.subr.bf16.mxu1 %v1831_v28 }
 0x385   :  { %1710 = vmatprep.subr.bf16.mxu0 %v1839_v60 }
 0x386   :  { %1679 = vmatmul.mubr.msk.bf16.vlgmr.msra.gmra.mrb[4].mxu1 %vm168_vm0, %v2257_v30 }
 0x387   :  { %1687 = vmatmul.mubr.msk.bf16.vlgmr.msra.gmra.mrb[8].mxu0 %vm168_vm0, %v2212_v9  ;;  %1691 = vmatpush3.bf16.msra.mxu1 %v1831_v28 }
 0x388   :  { %1692 = vmatprep.subr.bf16.mxu1 %v1832_v33  ;;  %1711 = vmatpush3.bf16.msra.mxu0 %v1839_v60 }
 0x389   :  { %1712 = vmatprep.subr.bf16.mxu0 %v1840_v61 }
 0x38b   :  { %1693 = vmatpush3.bf16.msra.mxu1 %v1832_v33 }
 0x38c   :  { %1694 = vmatprep.subr.bf16.mxu1 %v1833_v34  ;;  %1713 = vmatpush3.bf16.msra.mxu0 %v1840_v61 }
 0x38d   :  { %1714 = vmatprep.subr.bf16.mxu0 %v1841_v62 }
 0x38f   :  { %1695 = vmatpush3.bf16.msra.mxu1 %v1833_v34 }
 0x390   :  { %1696 = vmatprep.subr.bf16.mxu1 %v1834_v35  ;;  %1715 = vmatpush3.bf16.msra.mxu0 %v1841_v62 }
 0x391   :  { %1716 = vmatprep.subr.bf16.mxu0 %v1842_v63 }
 0x393   :  { %1697 = vmatpush3.bf16.msra.mxu1 %v1834_v35 }
 0x394   :  { %1698 = vmatprep.subr.bf16.mxu1 %v1835_v36  ;;  %1717 = vmatpush3.bf16.msra.mxu0 %v1842_v63 }
 0x395   :  { %1718 = vmatprep.subr.bf16.mxu0 %v1843_v0 }
 0x397   :  { %1699 = vmatpush3.bf16.msra.mxu1 %v1835_v36 }
 0x398   :  { %1700 = vmatprep.subr.bf16.mxu1 %v1836_v37  ;;  %1719 = vmatpush3.bf16.msra.mxu0 %v1843_v0 }
 0x399   :  { %1720 = vmatprep.subr.bf16.mxu0 %v1844_v1 }
 0x39b   :  { %1701 = vmatpush3.bf16.msra.mxu1 %v1836_v37 }
 0x39c   :  { %1702 = vmatprep.subr.bf16.mxu1 %v1837_v41  ;;  %1721 = vmatpush3.bf16.msra.mxu0 %v1844_v1 }
 0x39d   :  { %1722 = vmatprep.subr.bf16.mxu0 %v1845_v2 }
 0x39f   :  { %1703 = vmatpush3.bf16.msra.mxu1 %v1837_v41 }
 0x3a0   :  { %1704 = vmatprep.subr.bf16.mxu1 %v1838_v42  ;;  %1723 = vmatpush3.bf16.msra.mxu0 %v1845_v2 }
 0x3a1   :  { %1724 = vmatprep.subr.bf16.mxu0 %v1846_v3 }
 0x3a3   :  { %1705 = vmatpush3.bf16.msra.mxu1 %v1838_v42 }
 0x3a4   :  { %1730 = vmatprep.subr.bf16.mxu1 %v2061_v31  ;;  %1725 = vmatpush3.bf16.msra.mxu0 %v1846_v3 }
 0x459   :  { %v571_v45 = vpop.f32.mrb[4].mxu1 }
 0x45a   :  { %v1688_v46 = vpop.f32.mrb[8].mxu0  ;;  %577 = vst [vmem:[#allocation14] sm:$0xff] %v571_v45  ;;  %v1680_v48 = vpop.f32.mrb[5].mxu1 }
 0x45b   :  { %v668_v49 = vadd.f32 %v1688_v46, %v617_v44  ;;  %v652_v50 = vpop.f32.mrb[9].mxu0  ;;  %v574_v51 = vpop.f32.mrb[6].mxu1 }
 0x45c   :  { %v666_v52 = vadd.f32 %v652_v50, %v615_v47  ;;  %v1689_v53 = vpop.f32.mrb[10].mxu0  ;;  %v1681_v55 = vpop.f32.mrb[7].mxu1  ;;  %v802_v50 = vsub.s32 7, %v2216_v38  ;;  %v2271_v51 = vld [vmem:[#allocation12 + $0x8] sm:$0xff] }
 0x45d   :  { %v655_v56 = vpop.f32.mrb[11].mxu0  ;;  %v670_v59 = vpack.c.bf16 %v668_v49, %v668_v49 }
 0x45e   :  { %v667_v57 = vadd.f32 %v655_v56, %v616_v54  ;;  %v810_v56 = vrot.slane %v2271_v51, %v2219_v39 }
 0x460   :  { %v669_v58 = vpack.c.bf16 %v667_v57, %v666_v52  ;;  %v803_v52 = vrot.slane %v2221_v40, %v802_v50  ;;  %v822_v40 = vrot.slane %v2271_v51, %v2226_v12 }
 0x462   :  { %1706 = vmatprep.mubr.bf16.mxu1 %v669_v58 }
 0x463   :  { %1707 = vmatmul.mubr.bf16.vlgmr.msra.gmra.mrb[8].mxu1 %v670_v59 }
 0x464   :  { %1734 = vmatprep.mubr.msk.bf16.mxu1 %vm2062_vm2, %v2061_v31 }
 0x536   :  { %v1708_v10 = vpop.f32.mrb[8].mxu1 }
 0x537   :  { %v757_v11 = vpop.f32.mrb[9].mxu1  ;;  %v766_v18 = vadd.f32 %v1708_v10, %v674_v8 }
 0x538   :  { %v1709_v14 = vpop.f32.mrb[10].mxu1  ;;  %v758_v16 = vadd.f32 %v757_v11, %v674_v8 }
 0x539   :  { %v760_v15 = vpop.f32.mrb[11].mxu1 }
 0x53a   :  { %v761_v17 = vadd.f32 %v760_v15, %v674_v8 }
 0x53c   :  { %v771_v19 = vadd.f32 %v761_v17, %v758_v16 }
 0x53e   :  { %v772_v20 = vadd.f32 %v771_v19, %v766_v18 }
 0x540   :  { %v773_v21 = vrot.slane %v772_v20, 4 }
 0x542   :  { %v774_v22 = vadd.f32 %v773_v21, %v772_v20 }
 0x544   :  { %v775_v23 = vrot.slane %v774_v22, 2 }
 0x546   :  { %v776_v24 = vadd.f32 %v775_v23, %v774_v22 }
 0x548   :  { %v777_v25 = vrot.slane %v776_v24, 1 }
 0x54a   :  { %v778_v26 = vadd.f32 %v777_v25, %v776_v24 }
 0x54c   :  { %v779_v27 = vmul.f32 0.041666668, %v778_v26 }
 0x54e   :  { %v780_v28 = vsub.f32 %v758_v16, %v779_v27  ;;  %v781_v29 = vsub.f32 %v761_v17, %v779_v27  ;;  %v782_v33 = vsub.f32 %v766_v18, %v779_v27 }
 0x550   :  { %v783_v34 = vmul.f32 %v780_v28, %v780_v28  ;;  %v784_v35 = vmul.f32 %v781_v29, %v781_v29  ;;  %v785_v36 = vmul.f32 %v782_v33, %v782_v33 }
 0x552   :  { %v786_v37 = vadd.f32 %v784_v35, %v783_v34 }
 0x554   :  { %v787_v41 = vadd.f32 %v786_v37, %v785_v36 }
 0x556   :  { %v788_v42 = vrot.slane %v787_v41, 4 }
 0x558   :  { %v789_v43 = vadd.f32 %v788_v42, %v787_v41 }
 0x55a   :  { %v790_v44 = vrot.slane %v789_v43, 2 }
 0x55c   :  { %v791_v45 = vadd.f32 %v790_v44, %v789_v43 }
 0x55e   :  { %v792_v46 = vrot.slane %v791_v45, 1 }
 0x560   :  { %v793_v47 = vadd.f32 %v792_v46, %v791_v45 }
 0x562   :  { %v794_v48 = vmul.f32 0.041666668, %v793_v47 }
 0x564   :  { %v795_v49 = vadd.f32 1e-05, %v794_v48 }
 0x566   :  { %1867 = vrsqrt.f32 %v795_v49  ;;  %v951_v49 = vrot.slane %v2271_v51, %v370_v13 }
 0x570   :  { %v1868_v53 = vpop.eup %1867 }
 0x571   :  { %v798_v54 = vmul.f32 %v1868_v53, %v781_v29  ;;  %v797_v55 = vmul.f32 %v1868_v53, %v780_v28  ;;  %v799_v57 = vmul.f32 %v1868_v53, %v782_v33  ;;  %v958_v53 = vrot.slane %v2271_v51, %v382_v32  ;;  %v1847_v32 = vld [vmem:[#allocation10 + $0xc0] sm:$0xff]  }
 0x573   :  { %v805_v58 = vmul.f32 %v803_v52, %v798_v54  ;;  %v804_v59 = vmul.f32 %v803_v52, %v797_v55  ;;  %v806_v60 = vmul.f32 %v803_v52, %v799_v57 }
 0x575   :  { %v811_v61 = vadd.f32 %v810_v56, %v804_v59  ;;  %v812_v62 = vadd.f32 %v810_v56, %v805_v58  ;;  %v813_v63 = vadd.f32 %v810_v56, %v806_v60 }
 0x577   :  { %v814_v0 = vmax.f32 %v811_v61, 0.0  ;;  %v815_v1 = vmax.f32 %v812_v62, 0.0  ;;  %v816_v2 = vmax.f32 %v813_v63, 0.0 }
 0x579   :  { %v817_v3 = vpack.c.bf16 %v815_v1, %v814_v0  ;;  %v818_v8 = vpack.c.bf16 %v816_v2, %v816_v2 }
 0x57b   :  { %1726 = vmatprep.mubr.bf16.mxu0 %v817_v3 }
 0x57c   :  { %1727 = vmatmul.mubr.bf16.vlgmr.msra.gmra.mrb[12].mxu0 %v818_v8  ;;  %v1848_v8 = vld [vmem:[#allocation10 + $0xc8] sm:$0xff]  }
 0x57d   :  { %1742 = vmatprep.mubr.msk.bf16.mxu0 %vm168_vm0, %v2206_v5 }
 0x64f   :  { %v1728_v10 = vpop.f32.mrb[12].mxu0 }
 0x650   :  { %v905_v11 = vpop.f32.mrb[13].mxu0  ;;  %v914_v18 = vadd.f32 %v1728_v10, %v822_v40  ;;  %v1850_v10 = vld [vmem:[#allocation10 + $0xd8] sm:$0xff]  }
 0x651   :  { %v1729_v14 = vpop.f32.mrb[14].mxu0  ;;  %v906_v16 = vadd.f32 %v905_v11, %v822_v40  ;;  %v1851_v11 = vld [vmem:[#allocation10 + $0xe0] sm:$0xff]  }
 0x652   :  { %v908_v15 = vpop.f32.mrb[15].mxu0  ;;  %v1852_v14 = vld [vmem:[#allocation10 + $0xe8] sm:$0xff]  }
 0x653   :  { %v909_v17 = vadd.f32 %v908_v15, %v822_v40  ;;  %v1849_v40 = vld [vmem:[#allocation10 + $0xd0] sm:$0xff]  }
 0x654   :  { %v1853_v15 = vld [vmem:[#allocation10 + $0xf0] sm:$0xff]  }
 0x655   :  { %v919_v19 = vadd.f32 %v909_v17, %v906_v16 }
 0x657   :  { %v920_v20 = vadd.f32 %v919_v19, %v914_v18 }
 0x659   :  { %v921_v21 = vrot.slane %v920_v20, 4 }
 0x65b   :  { %v922_v22 = vadd.f32 %v921_v21, %v920_v20 }
 0x65d   :  { %v923_v23 = vrot.slane %v922_v22, 2 }
 0x65f   :  { %v924_v24 = vadd.f32 %v923_v23, %v922_v22 }
 0x661   :  { %v925_v25 = vrot.slane %v924_v24, 1 }
 0x663   :  { %v926_v26 = vadd.f32 %v925_v25, %v924_v24 }
 0x665   :  { %v927_v27 = vmul.f32 0.041666668, %v926_v26 }
 0x667   :  { %v928_v5 = vsub.f32 %v906_v16, %v927_v27  ;;  %v929_v28 = vsub.f32 %v909_v17, %v927_v27  ;;  %v930_v29 = vsub.f32 %v914_v18, %v927_v27  ;;  %v1854_v16 = vld [vmem:[#allocation10 + $0xf8] sm:$0xff]  }
 0x669   :  { %v931_v33 = vmul.f32 %v928_v5, %v928_v5  ;;  %v932_v34 = vmul.f32 %v929_v28, %v929_v28  ;;  %v933_v35 = vmul.f32 %v930_v29, %v930_v29 }
 0x66b   :  { %v934_v36 = vadd.f32 %v932_v34, %v931_v33 }
 0x66d   :  { %v935_v37 = vadd.f32 %v934_v36, %v933_v35  ;;  %v1855_v35 = vld [vmem:[#allocation10 + $0x100] sm:$0xff]   ;;  %v1856_v36 = vld [vmem:[#allocation10 + $0x108] sm:$0xff]  }
 0x66f   :  { %v936_v41 = vrot.slane %v935_v37, 4 }
 0x671   :  { %v937_v42 = vadd.f32 %v936_v41, %v935_v37  ;;  %v1857_v37 = vld [vmem:[#allocation10 + $0x110] sm:$0xff]   ;;  %v1858_v41 = vld [vmem:[#allocation10 + $0x118] sm:$0xff]  }
 0x673   :  { %v938_v43 = vrot.slane %v937_v42, 2 }
 0x675   :  { %v939_v44 = vadd.f32 %v938_v43, %v937_v42  ;;  %v1859_v42 = vld [vmem:[#allocation10 + $0x120] sm:$0xff]   ;;  %v1860_v43 = vld [vmem:[#allocation10 + $0x128] sm:$0xff]  }
 0x677   :  { %v940_v45 = vrot.slane %v939_v44, 1 }
 0x679   :  { %v941_v46 = vadd.f32 %v940_v45, %v939_v44  ;;  %v1861_v44 = vld [vmem:[#allocation10 + $0x130] sm:$0xff]   ;;  %v1862_v45 = vld [vmem:[#allocation10 + $0x138] sm:$0xff]  }
 0x67b   :  { %v942_v47 = vmul.f32 0.041666668, %v941_v46  ;;  %v1110_v46 = vrot.slane %v2271_v51, %v511_v6 }
 0x67d   :  { %v943_v48 = vadd.f32 1e-05, %v942_v47 }
 0x67f   :  { %1869 = vrsqrt.f32 %v943_v48 }
 0x689   :  { %v1870_v52 = vpop.eup %1869 }
 0x68a   :  { %v945_v54 = vmul.f32 %v1870_v52, %v928_v5  ;;  %v946_v55 = vmul.f32 %v1870_v52, %v929_v28  ;;  %v947_v56 = vmul.f32 %v1870_v52, %v930_v29 }
 0x68c   :  { %v953_v57 = vmul.f32 %v951_v49, %v946_v55  ;;  %v952_v58 = vmul.f32 %v951_v49, %v945_v54  ;;  %v954_v59 = vmul.f32 %v951_v49, %v947_v56 }
 0x68e   :  { %v960_v60 = vadd.f32 %v958_v53, %v953_v57  ;;  %v959_v61 = vadd.f32 %v958_v53, %v952_v58  ;;  %v961_v62 = vadd.f32 %v958_v53, %v954_v59 }
 0x690   :  { %v963_v63 = vmax.f32 %v960_v60, 0.0  ;;  %v962_v0 = vmax.f32 %v959_v61, 0.0  ;;  %v964_v1 = vmax.f32 %v961_v62, 0.0 }
 0x692   :  { %966 = vst [vmem:[#allocation13 + $0x20] sm:$0xff] %v963_v63  ;;  %965 = vst [vmem:[#allocation13 + $0x8] sm:$0xff] %v962_v0  ;;  %v968_v13 = vpack.c.bf16 %v963_v63, %v962_v0  ;;  %v969_v2 = vpack.c.bf16 %v964_v1, %v964_v1 }
 0x693   :  { %967 = vst [vmem:[#allocation13 + $0x38] sm:$0xff] %v964_v1 }
 0x694   :  { %1731 = vmatpush3.bf16.msra.mxu1 %v968_v13  ;;  %1738 = vmatprep.subr.bf16.mxu0 %v968_v13  ;;  %v971_v3 = vsel %vm175_vm1, %v969_v2, 0 }
 0x695   :  { %1739 = vmatpush3.bf16.msra.mxu0 %v968_v13  ;;  %1732 = vmatprep.subr.bf16.mxu1 %v2061_v31 }
 0x696   :  { %1796 = vmatprep.subr.msk.bf16.mxu0 %vm175_vm1, %v969_v2 }
 0x698   :  { %1733 = vmatpush3.bf16.msra.mxu1 %v971_v3 }
 0x699   :  { %1741 = vmatpush3.bf16.msra.mxu0 %v971_v3  ;;  %1746 = vmatprep.subr.bf16.mxu1 %v1847_v32 }
 0x69a   :  { %1766 = vmatprep.subr.bf16.mxu0 %v1855_v35 }
 0x69b   :  { %1735 = vmatmul.mubr.msk.bf16.vlgmr.msra.gmra.mrb[12].mxu1 %vm168_vm0, %v2257_v30 }
 0x69c   :  { %1743 = vmatmul.mubr.msk.bf16.vlgmr.msra.gmra.mrb[16].mxu0 %vm168_vm0, %v2212_v9  ;;  %1747 = vmatpush3.bf16.msra.mxu1 %v1847_v32  ;;  %v1050_v9 = vstv %s1049_s11 }
 0x69d   :  { %1748 = vmatprep.subr.bf16.mxu1 %v1848_v8  ;;  %v1053_v17 = vmul.f32 %v1050_v9, %v964_v1  ;;  %v1051_v20 = vmul.f32 %v1050_v9, %v962_v0  ;;  %v1052_v27 = vmul.f32 %v1050_v9, %v963_v63  ;;  %1767 = vmatpush3.bf16.msra.mxu0 %v1855_v35 }
 0x69e   :  { %1768 = vmatprep.subr.bf16.mxu0 %v1856_v36 }
 0x6a0   :  { %1749 = vmatpush3.bf16.msra.mxu1 %v1848_v8 }
 0x6a1   :  { %1750 = vmatprep.subr.bf16.mxu1 %v1849_v40  ;;  %1769 = vmatpush3.bf16.msra.mxu0 %v1856_v36 }
 0x6a2   :  { %1770 = vmatprep.subr.bf16.mxu0 %v1857_v37 }
 0x6a4   :  { %1751 = vmatpush3.bf16.msra.mxu1 %v1849_v40 }
 0x6a5   :  { %1752 = vmatprep.subr.bf16.mxu1 %v1850_v10  ;;  %1771 = vmatpush3.bf16.msra.mxu0 %v1857_v37 }
 0x6a6   :  { %1772 = vmatprep.subr.bf16.mxu0 %v1858_v41 }
 0x6a8   :  { %1753 = vmatpush3.bf16.msra.mxu1 %v1850_v10 }
 0x6a9   :  { %1754 = vmatprep.subr.bf16.mxu1 %v1851_v11  ;;  %1773 = vmatpush3.bf16.msra.mxu0 %v1858_v41 }
 0x6aa   :  { %1774 = vmatprep.subr.bf16.mxu0 %v1859_v42 }
 0x6ac   :  { %1755 = vmatpush3.bf16.msra.mxu1 %v1851_v11 }
 0x6ad   :  { %1756 = vmatprep.subr.bf16.mxu1 %v1852_v14  ;;  %1775 = vmatpush3.bf16.msra.mxu0 %v1859_v42 }
 0x6ae   :  { %1776 = vmatprep.subr.bf16.mxu0 %v1860_v43 }
 0x6b0   :  { %1757 = vmatpush3.bf16.msra.mxu1 %v1852_v14 }
 0x6b1   :  { %1758 = vmatprep.subr.bf16.mxu1 %v1853_v15  ;;  %1777 = vmatpush3.bf16.msra.mxu0 %v1860_v43 }
 0x6b2   :  { %1778 = vmatprep.subr.bf16.mxu0 %v1861_v44 }
 0x6b4   :  { %1759 = vmatpush3.bf16.msra.mxu1 %v1853_v15 }
 0x6b5   :  { %1760 = vmatprep.subr.bf16.mxu1 %v1854_v16  ;;  %1779 = vmatpush3.bf16.msra.mxu0 %v1861_v44 }
 0x6b6   :  { %1780 = vmatprep.subr.bf16.mxu0 %v1862_v45 }
 0x6b8   :  { %1761 = vmatpush3.bf16.msra.mxu1 %v1854_v16 }
 0x6b9   :  { %1786 = vmatprep.subr.bf16.mxu1 %v2061_v31  ;;  %1781 = vmatpush3.bf16.msra.mxu0 %v1862_v45 }
 0x76e   :  { %v1007_v18 = vpop.f32.mrb[12].mxu1 }
 0x76f   :  { %v1744_v19 = vpop.f32.mrb[16].mxu0  ;;  %1013 = vst [vmem:[#allocation14 + $0x8] sm:$0xff] %v1007_v18  ;;  %v1736_v21 = vpop.f32.mrb[13].mxu1 }
 0x770   :  { %v1104_v22 = vadd.f32 %v1744_v19, %v1053_v17  ;;  %v1088_v23 = vpop.f32.mrb[17].mxu0  ;;  %v1010_v24 = vpop.f32.mrb[14].mxu1  ;;  %v1239_v19 = vrot.slane %v2271_v51, %v518_v7  ;;  %v1246_v21 = vrot.slane %v2271_v51, %v673_v4  ;;  %v1258_v7 = vrot.slane %v2271_v51, %v802_v50 }
 0x771   :  { %v1102_v25 = vadd.f32 %v1088_v23, %v1051_v20  ;;  %v1745_v26 = vpop.f32.mrb[18].mxu0  ;;  %v1737_v5 = vpop.f32.mrb[15].mxu1 }
 0x772   :  { %v1091_v28 = vpop.f32.mrb[19].mxu0  ;;  %v1106_v34 = vpack.c.bf16 %v1104_v22, %v1104_v22 }
 0x773   :  { %v1103_v29 = vadd.f32 %v1091_v28, %v1052_v27 }
 0x775   :  { %v1105_v33 = vpack.c.bf16 %v1103_v29, %v1102_v25 }
 0x777   :  { %1762 = vmatprep.mubr.bf16.mxu1 %v1105_v33 }
 0x778   :  { %1763 = vmatmul.mubr.bf16.vlgmr.msra.gmra.mrb[16].mxu1 %v1106_v34 }
 0x779   :  { %1790 = vmatprep.mubr.msk.bf16.mxu1 %vm2062_vm2, %v2061_v31 }
 0x84b   :  { %v1764_v47 = vpop.f32.mrb[16].mxu1 }
 0x84c   :  { %v1193_v48 = vpop.f32.mrb[17].mxu1  ;;  %v1202_v55 = vadd.f32 %v1764_v47, %v1110_v46 }
 0x84d   :  { %v1765_v49 = vpop.f32.mrb[18].mxu1  ;;  %v1194_v53 = vadd.f32 %v1193_v48, %v1110_v46 }
 0x84e   :  { %v1196_v52 = vpop.f32.mrb[19].mxu1 }
 0x84f   :  { %v1197_v54 = vadd.f32 %v1196_v52, %v1110_v46 }
 0x851   :  { %v1207_v56 = vadd.f32 %v1197_v54, %v1194_v53 }
 0x853   :  { %v1208_v57 = vadd.f32 %v1207_v56, %v1202_v55 }
 0x855   :  { %v1209_v58 = vrot.slane %v1208_v57, 4 }
 0x857   :  { %v1210_v59 = vadd.f32 %v1209_v58, %v1208_v57 }
 0x859   :  { %v1211_v60 = vrot.slane %v1210_v59, 2 }
 0x85b   :  { %v1212_v61 = vadd.f32 %v1211_v60, %v1210_v59 }
 0x85d   :  { %v1213_v62 = vrot.slane %v1212_v61, 1 }
 0x85f   :  { %v1214_v63 = vadd.f32 %v1213_v62, %v1212_v61 }
 0x861   :  { %v1215_v0 = vmul.f32 0.041666668, %v1214_v63 }
 0x863   :  { %v1216_v1 = vsub.f32 %v1194_v53, %v1215_v0  ;;  %v1217_v13 = vsub.f32 %v1197_v54, %v1215_v0  ;;  %v1218_v2 = vsub.f32 %v1202_v55, %v1215_v0 }
 0x865   :  { %v1219_v6 = vmul.f32 %v1216_v1, %v1216_v1  ;;  %v1220_v32 = vmul.f32 %v1217_v13, %v1217_v13  ;;  %v1221_v3 = vmul.f32 %v1218_v2, %v1218_v2 }
 0x867   :  { %v1222_v8 = vadd.f32 %v1220_v32, %v1219_v6 }
 0x869   :  { %v1223_v40 = vadd.f32 %v1222_v8, %v1221_v3  ;;  %v116_v8 = vld [vmem:[#allocation12 + $0x10] sm:$0x3] }
 0x86b   :  { %v1224_v10 = vrot.slane %v1223_v40, 4 }
 0x86d   :  { %v1225_v11 = vadd.f32 %v1224_v10, %v1223_v40  ;;  %v1387_v40 = vrot.slane %v116_v8, %v2219_v39 }
 0x86f   :  { %v1226_v14 = vrot.slane %v1225_v11, 2 }
 0x871   :  { %v1227_v15 = vadd.f32 %v1226_v14, %v1225_v11 }
 0x873   :  { %v1228_v16 = vrot.slane %v1227_v15, 1 }
 0x875   :  { %v1229_v9 = vadd.f32 %v1228_v16, %v1227_v15  ;;  %v1394_v15 = vrot.slane %v116_v8, %v2226_v12 }
 0x877   :  { %v1230_v17 = vmul.f32 0.041666668, %v1229_v9 }
 0x879   :  { %v1231_v18 = vadd.f32 1e-05, %v1230_v17 }
 0x87b   :  { %1871 = vrsqrt.f32 %v1231_v18 }
 0x885   :  { %v1872_v20 = vpop.eup %1871 }
 0x886   :  { %v1234_v22 = vmul.f32 %v1872_v20, %v1217_v13  ;;  %v1233_v23 = vmul.f32 %v1872_v20, %v1216_v1  ;;  %v1235_v24 = vmul.f32 %v1872_v20, %v1218_v2 }
 0x888   :  { %v1241_v25 = vmul.f32 %v1239_v19, %v1234_v22  ;;  %v1240_v26 = vmul.f32 %v1239_v19, %v1233_v23  ;;  %v1242_v27 = vmul.f32 %v1239_v19, %v1235_v24 }
 0x88a   :  { %v1247_v5 = vadd.f32 %v1246_v21, %v1240_v26  ;;  %v1248_v28 = vadd.f32 %v1246_v21, %v1241_v25  ;;  %v1249_v29 = vadd.f32 %v1246_v21, %v1242_v27 }
 0x88c   :  { %v1250_v33 = vmax.f32 %v1247_v5, 0.0  ;;  %v1251_v34 = vmax.f32 %v1248_v28, 0.0  ;;  %v1252_v35 = vmax.f32 %v1249_v29, 0.0 }
 0x88e   :  { %v1253_v36 = vpack.c.bf16 %v1251_v34, %v1250_v33  ;;  %v1254_v37 = vpack.c.bf16 %v1252_v35, %v1252_v35 }
 0x890   :  { %1782 = vmatprep.mubr.bf16.mxu0 %v1253_v36 }
 0x891   :  { %1783 = vmatmul.mubr.bf16.vlgmr.msra.gmra.mrb[20].mxu0 %v1254_v37 }
 0x964   :  { %v1784_v4 = vpop.f32.mrb[20].mxu0 }
 0x965   :  { %v1341_v41 = vpop.f32.mrb[21].mxu0  ;;  %v1350_v46 = vadd.f32 %v1784_v4, %v1258_v7 }
 0x966   :  { %v1785_v42 = vpop.f32.mrb[22].mxu0  ;;  %v1342_v44 = vadd.f32 %v1341_v41, %v1258_v7 }
 0x967   :  { %v1344_v43 = vpop.f32.mrb[23].mxu0 }
 0x968   :  { %v1345_v45 = vadd.f32 %v1344_v43, %v1258_v7 }
 0x96a   :  { %v1355_v47 = vadd.f32 %v1345_v45, %v1342_v44 }
 0x96c   :  { %v1356_v48 = vadd.f32 %v1355_v47, %v1350_v46 }
 0x96e   :  { %v1357_v49 = vrot.slane %v1356_v48, 4 }
 0x970   :  { %v1358_v52 = vadd.f32 %v1357_v49, %v1356_v48 }
 0x972   :  { %v1359_v53 = vrot.slane %v1358_v52, 2 }
 0x974   :  { %v1360_v54 = vadd.f32 %v1359_v53, %v1358_v52 }
 0x976   :  { %v1361_v55 = vrot.slane %v1360_v54, 1 }
 0x978   :  { %v1362_v56 = vadd.f32 %v1361_v55, %v1360_v54 }
 0x97a   :  { %v1363_v57 = vmul.f32 0.041666668, %v1362_v56 }
 0x97c   :  { %v1364_v58 = vsub.f32 %v1342_v44, %v1363_v57  ;;  %v1365_v38 = vsub.f32 %v1345_v45, %v1363_v57  ;;  %v1366_v59 = vsub.f32 %v1350_v46, %v1363_v57 }
 0x97e   :  { %v1367_v50 = vmul.f32 %v1364_v58, %v1364_v58  ;;  %v1368_v51 = vmul.f32 %v1365_v38, %v1365_v38  ;;  %v1369_v60 = vmul.f32 %v1366_v59, %v1366_v59 }
 0x980   :  { %v1370_v61 = vadd.f32 %v1368_v51, %v1367_v50 }
 0x982   :  { %v1371_v62 = vadd.f32 %v1370_v61, %v1369_v60 }
 0x984   :  { %v1372_v63 = vrot.slane %v1371_v62, 4 }
 0x986   :  { %v1373_v0 = vadd.f32 %v1372_v63, %v1371_v62 }
 0x988   :  { %v1374_v1 = vrot.slane %v1373_v0, 2 }
 0x98a   :  { %v1375_v13 = vadd.f32 %v1374_v1, %v1373_v0 }
 0x98c   :  { %v1376_v2 = vrot.slane %v1375_v13, 1 }
 0x98e   :  { %v1377_v6 = vadd.f32 %v1376_v2, %v1375_v13 }
 0x990   :  { %v1378_v32 = vmul.f32 0.041666668, %v1377_v6 }
 0x992   :  { %v1379_v3 = vadd.f32 1e-05, %v1378_v32 }
 0x994   :  { %1873 = vrsqrt.f32 %v1379_v3 }
 0x99e   :  { %v1874_v10 = vpop.eup %1873 }
 0x99f   :  { %v1381_v11 = vmul.f32 %v1874_v10, %v1364_v58  ;;  %v1382_v14 = vmul.f32 %v1874_v10, %v1365_v38  ;;  %v1383_v16 = vmul.f32 %v1874_v10, %v1366_v59 }
 0x9a1   :  { %v1389_v9 = vmul.f32 %v1387_v40, %v1382_v14  ;;  %v1388_v17 = vmul.f32 %v1387_v40, %v1381_v11  ;;  %v1390_v18 = vmul.f32 %v1387_v40, %v1383_v16 }
 0x9a3   :  { %v1396_v19 = vadd.f32 %v1394_v15, %v1389_v9  ;;  %v1395_v20 = vadd.f32 %v1394_v15, %v1388_v17  ;;  %v1397_v21 = vadd.f32 %v1394_v15, %v1390_v18 }
 0x9a5   :  { %v1399_v22 = vmax.f32 %v1396_v19, 0.0  ;;  %v1398_v23 = vmax.f32 %v1395_v20, 0.0  ;;  %v1400_v24 = vmax.f32 %v1397_v21, 0.0 }
 0x9a7   :  { %1402 = vst [vmem:[#allocation13 + $0x28] sm:$0xff] %v1399_v22  ;;  %1401 = vst [vmem:[#allocation13 + $0x10] sm:$0xff] %v1398_v23  ;;  %v1404_v25 = vpack.c.bf16 %v1399_v22, %v1398_v23  ;;  %v1405_v39 = vpack.c.bf16 %v1400_v24, %v1400_v24 }
 0x9a8   :  { %1403 = vst [vmem:[#allocation13 + $0x40] sm:$0xff] %v1400_v24 }
 0x9a9   :  { %1787 = vmatpush3.bf16.msra.mxu1 %v1404_v25  ;;  %v1407_v12 = vsel %vm175_vm1, %v1405_v39, 0 }
 0x9aa   :  { %1788 = vmatprep.subr.bf16.mxu1 %v2061_v31 }
 0x9ad   :  { %1789 = vmatpush3.bf16.msra.mxu1 %v1407_v12 }
 0x9b0   :  { %1791 = vmatmul.mubr.msk.bf16.vlgmr.msra.gmra.mrb[20].mxu1 %vm168_vm0, %v2257_v30 }
 0x9b1   :  { %2006 = shalt.err (!%p2003_p5)
}
 0x9b2   :  { %s2007_s19 = scalar_lea.hbm %s2347_s7, 1152 }
 0x9b3   :  { %p2008_p6 = scmp.ne.s32.totalorder %s2347_s7, %s2007_s19  ;;  %p2011_p7 = scmp.lt.u32.totalorder %s2007_s19, %s2347_s7 }
 0x9b5   :  { %p2013_p8 = pnand %p2011_p7, %p2008_p6 }
 0x9b7   :  { %2016 = shalt.err (!%p2013_p8)
}
 0x9b8   :  { %s2064_s22 = smov 384   ;;  %s2065_s23 = smov 24  }
 0x9b9   :  { %1461 = dma.vmem_to_hbm [thread:$0]  %s1456_s13, 1152, %s2347_s7, [#allocation4], %s2064_s22, %s2064_s22, %s2065_s23  }
 0x9ba   :  { %s2066_s26 = smov [#allocation14]  }
 0x9bb   :  { %s1468_s27 = sshll.u32 %s2066_s26, 4  ;;  %s1469_s27 = int_to_ptr.vmem [resolvable:$true] %s1468_s27 }
 0x9bc   :  { %s2017_s29 = scalar_lea.vmem %s1469_s27, 384  ;;  %p2022_p10 = scmp.lt.s32.totalorder %s1469_s27, %s1469_s27 }
 0x9bd   :  { %p2018_p9 = scmp.ne.s32.totalorder %s1469_s27, %s2017_s29  ;;  %p2023_p11 = scmp.lt.s32.totalorder %s2017_s29, %s2017_s29 }
 0x9bf   :  { %p2024_p12 = por %p2023_p11, %p2022_p10 }
 0x9c1   :  { %p2025_p13 = pnand %p2024_p12, %p2018_p9 }
 0xa83   :  { %v1443_v31 = vpop.f32.mrb[20].mxu1 }
 0xa84   :  { %1449 = vst [vmem:[#allocation14 + $0x10] sm:$0xff] %v1443_v31  ;;  %v1792_v30 = vpop.f32.mrb[21].mxu1 }
 0xa85   :  { %v1446_v26 = vpop.f32.mrb[22].mxu1 }
 0xa86   :  { %2028 = shalt.err (!%p2025_p13)
}
 0xa87   :  { %s2029_s4 = scalar_lea.hbm %s2348_s8, 384 }
 0xa88   :  { %p2030_p0 = scmp.ne.s32.totalorder %s2348_s8, %s2029_s4  ;;  %p2033_p1 = scmp.lt.u32.totalorder %s2029_s4, %s2348_s8 }
 0xa8a   :  { %p2035_p2 = pnand %p2033_p1, %p2030_p0 }
 0xa8c   :  { %2038 = shalt.err (!%p2035_p2)
}
 0xa8d   :  { %1471 = dma.vmem_to_hbm [thread:$0]  %s1469_s27, 384, %s2348_s8, [#allocation15]   ;;  %v1793_v27 = vpop.f32.mrb[23].mxu1 }
 0xa8e   :  { %2047 = dma.done.wait [#allocation4], 1152  }
 0xa8f   :  { %2048 = vsyncadd [#allocation4], 4294966144 }
 0xa90   :  { %2049 = dma.done.wait [#allocation15], 384  }
 0xa91   :  { %2050 = vsyncadd [#allocation15], 4294966912 }
 0xa92   :  { %1478 = vsyncpa [#allocation3], 1 }
 0xa93   :  { %1479 = vsyncpa [#allocation8], 1 }
 0xa94   :  { %1480 = vsyncpa [#allocation11], 1 }
 0xa95   :  { %1481 = vsyncpa [#allocation4], 1 }
 0xa96   :  { %1482 = vsyncpa [#allocation15], 1 }
 0xa97   :  { %1483 = vsyncpa [#allocation5], 1 }

</bundles_post_ra>
